<compile_context>
chip_gen: v7x
topology: tpu7x:2x2x1
jax: 0.10.0
libtpu: 0.0.40
codegen_flags: <defaults>
</compile_context>

<pallas_src>
import functools

import numpy as np
import jax
import jax.numpy as jnp
from jax.experimental import pallas as pl
from jax.experimental.pallas import tpu as pltpu

EPS = 1e-4
SILU_GAIN = 1.0 / 0.596             # mp_silu(x) = silu(x) / 0.596
MP_SUM_SCALE = 1.0 / np.sqrt(0.5)   # mp_sum(a, b, t=0.5) = (a/2 + b/2) / sqrt(0.5)
COMPUTE_DTYPE = jnp.bfloat16        # MXU input / intermediate activation dtype
LANE = 128


def _round_up(x, m):
    return ((x + m - 1) // m) * m


# ---------------------------------------------------------------------------
# Parameter preprocessing (glue): MP_GeoLinear / MPConv weight normalization.
# normalize(w): per-output-row L2 norm, norm = eps + norm/sqrt(fan_in), then
# scale by gain/sqrt(fan_in).  Returned transposed (in, out), f32.
# ---------------------------------------------------------------------------
def _normalize_and_scale_weight(w, gain=1.0):
    wf = w.astype(jnp.float32)
    fan_in = wf.shape[1]
    norm = jnp.sqrt(jnp.sum(wf * wf, axis=1, keepdims=True))
    norm = EPS + norm / np.sqrt(fan_in)
    wn = (wf / norm) * (gain / np.sqrt(fan_in))
    return wn.T  # (in, out)


# ---------------------------------------------------------------------------
# Graph preprocessing (host-side, once per graph, reused across forward calls):
#   * dense degree-normalized adjacency (incoming sum / sqrt(max(deg,1)),
#     matching MP_Sum_Aggregation), padded to the tile grid, stored in bf16;
#   * per row-tile compacted nonzero column-tile indices + counts (1D int32,
#     SMEM-friendly) used for data-dependent BlockSpec index_maps so all-zero
#     adjacency tiles are never DMA'd.
# ---------------------------------------------------------------------------
def _choose_tiling(num_nodes):
    # Multiple of 512 so both tm choices and tk=256 divide n_pad.
    n_pad = _round_up(max(num_nodes, 512), 512)
    tk = 256                                   # fine-grained zero-block skipping
    tm = 512 if n_pad >= 2048 else 256         # keep n_i >= 2 (v7x megacore) at small N
    return n_pad, tm, tk


def prepare_graph(edge_index, num_nodes):
    n_pad, tm, tk = _choose_tiling(num_nodes)
    src = np.asarray(jax.device_get(edge_index[0]), dtype=np.int64)
    dst = np.asarray(jax.device_get(edge_index[1]), dtype=np.int64)

    a = np.zeros((n_pad, n_pad), np.float32)
    np.add.at(a, (dst, src), 1.0)
    deg = a.sum(axis=1, keepdims=True)
    a_norm = a / np.sqrt(np.maximum(deg, 1.0))

    n_i, n_k = n_pad // tm, n_pad // tk
    tile_nonzero = a.reshape(n_i, tm, n_k, tk).sum(axis=(1, 3)) > 0   # (n_i, n_k)
    counts = tile_nonzero.sum(axis=1).astype(np.int32)                # (n_i,)
    max_nnz = max(int(counts.max()), 1)

    nz = np.zeros((n_i, max_nnz), np.int32)
    for i in range(n_i):
        cols = np.nonzero(tile_nonzero[i])[0].astype(np.int32)
        if cols.size > 0:
            nz[i, :cols.size] = cols
            nz[i, cols.size:] = cols[-1]   # repeat last valid index -> no re-DMA
        # cols.size == 0: leave zeros; counts[i] == 0 skips the matmul anyway.

    return {
        "a_norm": jnp.asarray(a_norm, COMPUTE_DTYPE),
        "nz_cols": jnp.asarray(nz.reshape(-1)),   # 1D (n_i * max_nnz) int32 (SMEM)
        "counts": jnp.asarray(counts),            # 1D (n_i,) int32 (SMEM)
        "max_nnz": max_nnz,
        "n_pad": n_pad, "tm": tm, "tk": tk, "n_i": n_i, "n_k": n_k,
    }


# ---------------------------------------------------------------------------
# Fused MP_HIPGnnConv block (one pallas_call per GNN layer).  Inputs are the
# already-activated node features h = mp_silu(y_prev) in bf16:
#   agg  = A_norm @ h           (only nonzero adjacency tiles; f32 accumulator)
#   out  = agg @ Wl' + h_i @ Wr'   (mp_sum(t=0.5) scale folded into Wl'/Wr')
#   non-final layer:  o = bf16( silu(out) * SILU_GAIN )   (next layer's h)
#   final layer:      o = f32( out )  with lin_out pre-folded into Wl'/Wr'
#     -> lane-dense, 128-padded final GNN output slab.
# ---------------------------------------------------------------------------
def _hipgnn_conv_kernel(nz_ref, cnt_ref, hk_ref, hi_ref, a_ref, wl_ref, wr_ref,
                        o_ref, acc_ref, *, apply_silu):
    i = pl.program_id(0)
    j = pl.program_id(1)

    @pl.when(j == 0)
    def _():
        acc_ref[...] = jnp.zeros_like(acc_ref)

    @pl.when(j < cnt_ref[i])   # skip padded (replicated) adjacency tiles
    def _():
        acc_ref[...] += jnp.dot(a_ref[...], hk_ref[...],
                                preferred_element_type=jnp.float32)

    @pl.when(j == pl.num_programs(1) - 1)
    def _():
        out = jnp.dot(acc_ref[...].astype(COMPUTE_DTYPE), wl_ref[...],
                      preferred_element_type=jnp.float32)
        out = out + jnp.dot(hi_ref[...], wr_ref[...],
                            preferred_element_type=jnp.float32)
        if apply_silu:
            # Keep the silu math in f32; only the stored result is bf16.
            out = jax.nn.silu(out) * SILU_GAIN
        o_ref[...] = out.astype(o_ref.dtype)


def mp_hipgnn_conv_layer(h_act, graph_static, wl, wr, out_width, out_dtype,
                         apply_silu):
    n_pad, cemb = h_act.shape
    tm, tk = graph_static["tm"], graph_static["tk"]
    n_i = graph_static["n_i"]
    max_nnz = graph_static["max_nnz"]

    grid_spec = pltpu.PrefetchScalarGridSpec(
        num_scalar_prefetch=2,
        grid=(n_i, max_nnz),
        in_specs=[
            # h source tile — data-dependent column-tile index (DMA-level sparsity)
            pl.BlockSpec((tk, cemb), lambda i, j, nz, cnt: (nz[i * max_nnz + j], 0)),
            # h self tile (row tile i)
            pl.BlockSpec((tm, cemb), lambda i, j, nz, cnt: (i, 0)),
            # adjacency tile (i, nz[i, j]); padded j repeats the last index
            pl.BlockSpec((tm, tk), lambda i, j, nz, cnt: (i, nz[i * max_nnz + j])),
            # fused lin_l / lin_r weights (constant -> fetched once)
            pl.BlockSpec((cemb, out_width), lambda i, j, nz, cnt: (0, 0)),
            pl.BlockSpec((cemb, out_width), lambda i, j, nz, cnt: (0, 0)),
        ],
        out_specs=pl.BlockSpec((tm, out_width), lambda i, j, nz, cnt: (i, 0)),
        scratch_shapes=[pltpu.VMEM((tm, cemb), jnp.float32)],
    )
    kernel = functools.partial(_hipgnn_conv_kernel, apply_silu=apply_silu)
    return pl.pallas_call(
        kernel,
        out_shape=jax.ShapeDtypeStruct((n_pad, out_width), out_dtype),
        grid_spec=grid_spec,
        compiler_params=pltpu.CompilerParams(
            dimension_semantics=("parallel", "arbitrary"),
            vmem_limit_bytes=32 * 1024 * 1024,   # safe on v5e/v6e/v7x; usage ~1 MiB
        ),
    )(graph_static["nz_cols"], graph_static["counts"],
      h_act, h_act, graph_static["a_norm"], wl, wr)


# ---------------------------------------------------------------------------
# Parameter init (deterministic, matches shapes implied by __init__):
# all MP_GeoLinear weights standard-normal; cond_gain = zeros([]).
# ---------------------------------------------------------------------------
def init_params(key, in_ch, cemb, gnn_channels, num_gnn_layers):
    keys = jax.random.split(key, 2 + 2 * num_gnn_layers)
    params = {
        "lin_in": jax.random.normal(keys[0], (cemb, in_ch), jnp.float32),
        "convs": [],
        "lin_out": jax.random.normal(keys[-1], (gnn_channels, cemb), jnp.float32),
        "cond_gain": jnp.zeros((), jnp.float32),
    }
    for l in range(num_gnn_layers):
        wl = jax.random.normal(keys[1 + 2 * l], (cemb, cemb), jnp.float32)
        wr = jax.random.normal(keys[2 + 2 * l], (cemb, cemb), jnp.float32)
        params["convs"].append((wl, wr))
    return params


# ---------------------------------------------------------------------------
# HIGnnInterface.forward
# ---------------------------------------------------------------------------
def hignn_interface_forward(x, graph_static, params):
    b, c, h, w = x.shape
    n_pad = graph_static["n_pad"]

    # update_graph_image_nodes: NCHW -> (N, C) raster order (+ pad to tile grid)
    nodes = jnp.transpose(x, (0, 2, 3, 1)).reshape(-1, c)
    n = nodes.shape[0]
    nodes = jnp.pad(nodes.astype(jnp.float32), ((0, n_pad - n), (0, 0)))

    # lin_in (MP_GeoLinear with lazy in_channels = C): plain XLA (K=4, no MXU use).
    y = nodes @ _normalize_and_scale_weight(params["lin_in"])

    gnn_channels = params["lin_out"].shape[0]
    cemb = y.shape[1]
    w_out_t = _normalize_and_scale_weight(params["lin_out"])        # (cemb, gnn)

    if not params["convs"]:
        y_nodes = (y @ w_out_t)[:n]
    else:
        gnn_pad = _round_up(gnn_channels, LANE)
        w_out_pad = jnp.pad(w_out_t, ((0, 0), (0, gnn_pad - gnn_channels)))
        n_layers = len(params["convs"])

        # heterogenous_mp_silu before the first conv layer; later layers fuse it
        # into the previous kernel's epilogue.  Intermediate activations are bf16.
        act = (jax.nn.silu(y) * SILU_GAIN).astype(COMPUTE_DTYPE)

        for l, (wl, wr) in enumerate(params["convs"]):
            # mp_sum(t=0.5) scale folded into both weight halves.
            wl_t = _normalize_and_scale_weight(wl) * (0.5 * MP_SUM_SCALE)
            wr_t = _normalize_and_scale_weight(wr) * (0.5 * MP_SUM_SCALE)
            last = (l == n_layers - 1)
            if last:
                # Fold lin_out into the last conv layer: lane-dense padded output.
                wl_t = wl_t @ w_out_pad
                wr_t = wr_t @ w_out_pad
                out_width, out_dtype = gnn_pad, jnp.float32
            else:
                out_width, out_dtype = cemb, COMPUTE_DTYPE
            act = mp_hipgnn_conv_layer(
                act, graph_static,
                wl_t.astype(COMPUTE_DTYPE), wr_t.astype(COMPUTE_DTYPE),
                out_width, out_dtype, apply_silu=not last)
            # TODO(synk): heterogenous_apply_scaling(mp_meta_path_factors) is a
            # no-op here (reference passes dropout=0.0 positionally; the
            # homogeneous tensor path returns x unchanged).
        y_nodes = act[:n, :gnn_channels]

    graph = {"image_node": y_nodes}                        # update_graph_embeddings
    # extract_image_nodes: (N, gnn_ch) -> (B, gnn_ch, H, W)
    out = jnp.transpose(y_nodes.reshape(b, h, w, -1), (0, 3, 1, 2))
    out = out * params["cond_gain"]                        # zero-init, as in __init__
    # TODO(synk): training-mode dropout on `out` not implemented (inference path).
    return out, graph


# ---------------------------------------------------------------------------
# Pure-JAX f32 reference of the node path (for correctness verification).
# ---------------------------------------------------------------------------
def _reference_forward_nodes(x, edge_index, params):
    b, c, hh, ww = x.shape
    nodes = jnp.transpose(x, (0, 2, 3, 1)).reshape(-1, c).astype(jnp.float32)
    n = nodes.shape[0]
    src, dst = edge_index[0], edge_index[1]
    a = jnp.zeros((n, n), jnp.float32).at[dst, src].add(1.0)
    deg = jnp.sum(a, axis=1, keepdims=True)
    a_norm = a / jnp.sqrt(jnp.maximum(deg, 1.0))
    y = nodes @ _normalize_and_scale_weight(params["lin_in"])
    for wl, wr in params["convs"]:
        hact = jax.nn.silu(y) * SILU_GAIN
        agg = a_norm @ hact
        out_l = agg @ _normalize_and_scale_weight(wl)
        out_r = hact @ _normalize_and_scale_weight(wr)
        y = (0.5 * out_l + 0.5 * out_r) * MP_SUM_SCALE
    return y @ _normalize_and_scale_weight(params["lin_out"])


if __name__ == "__main__":
    key = jax.random.PRNGKey(0)
    B, C, H, W = 2, 4, 16, 16
    cemb, gnn_channels, num_gnn_layers = 128, 32, 2

    kx, kp = jax.random.split(key)
    x = jax.random.normal(kx, (B, C, H, W), jnp.float32)
    params = init_params(kp, C, cemb, gnn_channels, num_gnn_layers)

    # Deterministic synthetic graph over the image nodes: two directed rings.
    N = B * H * W
    base = jnp.arange(N, dtype=jnp.int32)
    src = jnp.concatenate([base, base])
    dst = jnp.concatenate([(base + 1) % N, (base + 5) % N])
    edge_index = jnp.stack([src, dst])

    # Graph structure is static: adjacency + compacted tile indices built once.
    graph_static = prepare_graph(edge_index, N)

    out, graph = hignn_interface_forward(x, graph_static, params)
    jax.block_until_ready(out)
    nodes_out = jax.block_until_ready(graph["image_node"])

    assert out.shape == (B, gnn_channels, H, W)
    assert nodes_out.shape == (N, gnn_channels)
    assert bool(jnp.all(jnp.isfinite(nodes_out)))

    # Verify against the pure-JAX f32 reference (bf16 MXU inputs + bf16
    # intermediate activations -> loose tolerance).
    ref = _reference_forward_nodes(x, edge_index, params)
    err = float(jnp.max(jnp.abs(nodes_out - ref)) / (jnp.max(jnp.abs(ref)) + 1e-6))
    assert err < 0.1, f"mismatch vs reference: normalized max err {err:.4f}"

    print("KERNEL_OK")
</pallas_src>

<mosaic_0001>
module attributes {stable_mosaic.version = 11 : i64} {
  func.func @_hipgnn_conv_kernel(%arg0: i32, %arg1: i32, %arg2: memref<4xi32, #tpu.memory_space<smem>>, %arg3: memref<2xi32, #tpu.memory_space<smem>>, %arg4: memref<256x128xbf16, #tpu.memory_space<vmem>>, %arg5: memref<256x128xbf16, #tpu.memory_space<vmem>>, %arg6: memref<256x256xbf16, #tpu.memory_space<vmem>>, %arg7: memref<128x128xbf16, #tpu.memory_space<vmem>>, %arg8: memref<128x128xbf16, #tpu.memory_space<vmem>>, %arg9: memref<256x128xbf16, #tpu.memory_space<vmem>>, %arg10: memref<256x128xf32, #tpu.memory_space<vmem>>) attributes {dimension_semantics = [#tpu.dimension_semantics<parallel>, #tpu.dimension_semantics<arbitrary>], iteration_bounds = array<i64: 2, 2>, scalar_prefetch = 2 : i64, scratch_operands = 1 : i64, tpu.core_type = #tpu.core_type<tc>, window_params = [{transform_indices = @transform_0, window_bounds = array<i64: 256, 128>}, {transform_indices = @transform_1, window_bounds = array<i64: 256, 128>}, {transform_indices = @transform_2, window_bounds = array<i64: 256, 256>}, {pipeline_mode = #tpu.pipeline_mode<synchronous>, transform_indices = @transform_3, window_bounds = array<i64: 128, 128>}, {pipeline_mode = #tpu.pipeline_mode<synchronous>, transform_indices = @transform_4, window_bounds = array<i64: 128, 128>}, {transform_indices = @transform_5, window_bounds = array<i64: 256, 128>}]} {
    %c0_i32 = arith.constant 0 : i32
    %0 = arith.cmpi eq, %arg1, %c0_i32 : i32
    %1 = arith.extui %0 : i1 to i32
    %c0_i32_0 = arith.constant 0 : i32
    %2 = arith.cmpi ne, %1, %c0_i32_0 : i32
    scf.if %2 {
      %cst = arith.constant 0.000000e+00 : f32
      %11 = vector.broadcast %cst : f32 to vector<256x128xf32>
      %c0 = arith.constant 0 : index
      %c0_3 = arith.constant 0 : index
      %12 = vector.load %arg10[%c0, %c0_3] : memref<256x128xf32, #tpu.memory_space<vmem>>, vector<256x128xf32>
      tpu.vector_store %arg10[%c0, %c0_3], %11 {strides = array<i32>} : memref<256x128xf32, #tpu.memory_space<vmem>>, vector<256x128xf32>,
    } else {
    }
    %3 = arith.index_cast %arg0 : i32 to index
    %4 = memref.load %arg3[%3] : memref<2xi32, #tpu.memory_space<smem>>
    %5 = arith.cmpi slt, %arg1, %4 : i32
    %6 = arith.extui %5 : i1 to i32
    %c0_i32_1 = arith.constant 0 : i32
    %7 = arith.cmpi ne, %6, %c0_i32_1 : i32
    scf.if %7 {
      %c0 = arith.constant 0 : index
      %c0_3 = arith.constant 0 : index
      %11 = vector.load %arg10[%c0, %c0_3] : memref<256x128xf32, #tpu.memory_space<vmem>>, vector<256x128xf32>
      %c0_4 = arith.constant 0 : index
      %c0_5 = arith.constant 0 : index
      %12 = vector.load %arg6[%c0_4, %c0_5] : memref<256x256xbf16, #tpu.memory_space<vmem>>, vector<256x256xbf16>
      %c0_6 = arith.constant 0 : index
      %c0_7 = arith.constant 0 : index
      %13 = vector.load %arg4[%c0_6, %c0_7] : memref<256x128xbf16, #tpu.memory_space<vmem>>, vector<256x128xbf16>
      %cst = arith.constant dense<0.000000e+00> : vector<256x128xf32>
      %14 = tpu.matmul %12, %13, %cst {dimension_numbers = #tpu.dot_dimension_numbers<[1], [0], [0], [1], [0, 0, 1, 1], [], []>} : vector<256x256xbf16>, vector<256x128xbf16>, vector<256x128xf32> -> vector<256x128xf32>
      %15 = arith.addf %11, %14 : vector<256x128xf32>
      %c0_8 = arith.constant 0 : index
      %c0_9 = arith.constant 0 : index
      %16 = vector.load %arg10[%c0_8, %c0_9] : memref<256x128xf32, #tpu.memory_space<vmem>>, vector<256x128xf32>
      tpu.vector_store %arg10[%c0_8, %c0_9], %15 {strides = array<i32>} : memref<256x128xf32, #tpu.memory_space<vmem>>, vector<256x128xf32>,
    } else {
    }
    %c1_i32 = arith.constant 1 : i32
    %8 = arith.cmpi eq, %arg1, %c1_i32 : i32
    %9 = arith.extui %8 : i1 to i32
    %c0_i32_2 = arith.constant 0 : i32
    %10 = arith.cmpi ne, %9, %c0_i32_2 : i32
    scf.if %10 {
      %c0 = arith.constant 0 : index
      %c0_3 = arith.constant 0 : index
      %11 = vector.load %arg10[%c0, %c0_3] : memref<256x128xf32, #tpu.memory_space<vmem>>, vector<256x128xf32>
      %12 = arith.truncf %11 : vector<256x128xf32> to vector<256x128xbf16>
      %c0_4 = arith.constant 0 : index
      %c0_5 = arith.constant 0 : index
      %13 = vector.load %arg7[%c0_4, %c0_5] : memref<128x128xbf16, #tpu.memory_space<vmem>>, vector<128x128xbf16>
      %cst = arith.constant dense<0.000000e+00> : vector<256x128xf32>
      %14 = tpu.matmul %12, %13, %cst {dimension_numbers = #tpu.dot_dimension_numbers<[1], [0], [0], [1], [0, 0, 1, 1], [], []>} : vector<256x128xbf16>, vector<128x128xbf16>, vector<256x128xf32> -> vector<256x128xf32>
      %c0_6 = arith.constant 0 : index
      %c0_7 = arith.constant 0 : index
      %15 = vector.load %arg5[%c0_6, %c0_7] : memref<256x128xbf16, #tpu.memory_space<vmem>>, vector<256x128xbf16>
      %c0_8 = arith.constant 0 : index
      %c0_9 = arith.constant 0 : index
      %16 = vector.load %arg8[%c0_8, %c0_9] : memref<128x128xbf16, #tpu.memory_space<vmem>>, vector<128x128xbf16>
      %cst_10 = arith.constant dense<0.000000e+00> : vector<256x128xf32>
      %17 = tpu.matmul %15, %16, %cst_10 {dimension_numbers = #tpu.dot_dimension_numbers<[1], [0], [0], [1], [0, 0, 1, 1], [], []>} : vector<256x128xbf16>, vector<128x128xbf16>, vector<256x128xf32> -> vector<256x128xf32>
      %18 = arith.addf %14, %17 : vector<256x128xf32>
      %19 = arith.negf %18 : vector<256x128xf32>
      %20 = math.exp %19 : vector<256x128xf32>
      %cst_11 = arith.constant 1.000000e+00 : f32
      %21 = vector.broadcast %cst_11 : f32 to vector<256x128xf32>
      %22 = arith.addf %21, %20 : vector<256x128xf32>
      %23 = arith.divf %21, %22 : vector<256x128xf32>
      %24 = arith.mulf %18, %23 : vector<256x128xf32>
      %cst_12 = arith.constant 1.67785239 : f32
      %25 = vector.broadcast %cst_12 : f32 to vector<256x128xf32>
      %26 = arith.mulf %24, %25 : vector<256x128xf32>
      %27 = arith.truncf %26 : vector<256x128xf32> to vector<256x128xbf16>
      %c0_13 = arith.constant 0 : index
      %c0_14 = arith.constant 0 : index
      %28 = vector.load %arg9[%c0_13, %c0_14] : memref<256x128xbf16, #tpu.memory_space<vmem>>, vector<256x128xbf16>
      tpu.vector_store %arg9[%c0_13, %c0_14], %27 {strides = array<i32>} : memref<256x128xbf16, #tpu.memory_space<vmem>>, vector<256x128xbf16>,
    } else {
    }
    return
  }
  func.func @transform_0(%arg0: i32, %arg1: i32, %arg2: memref<4xi32, #tpu.memory_space<smem>>, %arg3: memref<2xi32, #tpu.memory_space<smem>>) -> (i32, i32) {
    %c2_i32 = arith.constant 2 : i32
    %0 = arith.muli %arg0, %c2_i32 : i32
    %1 = arith.addi %0, %arg1 : i32
    %2 = arith.index_cast %1 : i32 to index
    %3 = memref.load %arg2[%2] : memref<4xi32, #tpu.memory_space<smem>>
    %c0_i32 = arith.constant 0 : i32
    %c0_i32_0 = arith.constant 0 : i32
    return %3, %c0_i32 : i32, i32
  }
  func.func @transform_1(%arg0: i32, %arg1: i32, %arg2: memref<4xi32, #tpu.memory_space<smem>>, %arg3: memref<2xi32, #tpu.memory_space<smem>>) -> (i32, i32) {
    %c0_i32 = arith.constant 0 : i32
    %c0_i32_0 = arith.constant 0 : i32
    return %arg0, %c0_i32 : i32, i32
  }
  func.func @transform_2(%arg0: i32, %arg1: i32, %arg2: memref<4xi32, #tpu.memory_space<smem>>, %arg3: memref<2xi32, #tpu.memory_space<smem>>) -> (i32, i32) {
    %c2_i32 = arith.constant 2 : i32
    %0 = arith.muli %arg0, %c2_i32 : i32
    %1 = arith.addi %0, %arg1 : i32
    %2 = arith.index_cast %1 : i32 to index
    %3 = memref.load %arg2[%2] : memref<4xi32, #tpu.memory_space<smem>>
    %c0_i32 = arith.constant 0 : i32
    return %arg0, %3 : i32, i32
  }
  func.func @transform_3(%arg0: i32, %arg1: i32, %arg2: memref<4xi32, #tpu.memory_space<smem>>, %arg3: memref<2xi32, #tpu.memory_space<smem>>) -> (i32, i32) {
    %c0_i32 = arith.constant 0 : i32
    %c0_i32_0 = arith.constant 0 : i32
    %c0_i32_1 = arith.constant 0 : i32
    return %c0_i32, %c0_i32_0 : i32, i32
  }
  func.func @transform_4(%arg0: i32, %arg1: i32, %arg2: memref<4xi32, #tpu.memory_space<smem>>, %arg3: memref<2xi32, #tpu.memory_space<smem>>) -> (i32, i32) {
    %c0_i32 = arith.constant 0 : i32
    %c0_i32_0 = arith.constant 0 : i32
    %c0_i32_1 = arith.constant 0 : i32
    return %c0_i32, %c0_i32_0 : i32, i32
  }
  func.func @transform_5(%arg0: i32, %arg1: i32, %arg2: memref<4xi32, #tpu.memory_space<smem>>, %arg3: memref<2xi32, #tpu.memory_space<smem>>) -> (i32, i32) {
    %c0_i32 = arith.constant 0 : i32
    %c0_i32_0 = arith.constant 0 : i32
    return %arg0, %c0_i32 : i32, i32
  }
}

</mosaic_0001>

<bundles_post_ra>
// kernel: tpu_custom_call.1
= control target key start
LH: loop header
LB: loop body
LE: loop exit
PB: predicated region body
PF: predicated region fallthrough
CT: control target
= control target key end

     0   :  { %s4360_s0 = inlined_call_operand.hbm [shape: s32[4], index: 0, kind: input, shape index: {}]   ;;  %s4361_s2 = inlined_call_operand.hbm [shape: bf16[512,128], index: 2, kind: input, shape index: {}]   ;;  %s4362_s3 = inlined_call_operand.hbm [shape: bf16[512,128], index: 3, kind: input, shape index: {}]   ;;  %s4363_s4 = inlined_call_operand.hbm [shape: bf16[512,512], index: 4, kind: input, shape index: {}]   ;;  %s4364_s5 = inlined_call_operand.hbm [shape: bf16[128,128], index: 5, kind: input, shape index: {}]   ;;  %s4365_s6 = inlined_call_operand.hbm [shape: bf16[128,128], index: 6, kind: input, shape index: {}]   ;;  %s4366_s7 = inlined_call_operand.hbm [shape: bf16[512,128], index: 7, kind: output, shape index: {}]   ;;  %s4367_s1 = inlined_call_operand.vmem [shape: s32[2], index: 1, kind: input, shape index: {}]  }
   0x1   :  { %4401 = sst [smem:[#allocation42_spill]] %s4362_s3  ;;  %s3249_s26 = scalar_lea.hbm %s4360_s0, 16 }
   0x2   :  { %4402 = sst [smem:[#allocation43_spill]] %s4364_s5  ;;  %p3250_p0 = scmp.ne.s32.totalorder %s4360_s0, %s3249_s26 }
   0x3   :  { %4403 = sst [smem:[#allocation44_spill]] %s4365_s6  ;;  %p3253_p1 = scmp.lt.u32.totalorder %s3249_s26, %s4360_s0 }
   0x4   :  { %4404 = sst [smem:[#allocation45_spill]] %s4366_s7 }
   0x5   :  { %p3255_p2 = pnand %p3253_p1, %p3250_p0 }
   0x7   :  { %3258 = shalt.err (!%p3255_p2)  }
   0x8   :  { %s3579_s8 = smov [#allocation4]   ;;  %s14_s13 = sshll.u32 %s4367_s1, 4  ;;  %s15_s13 = int_to_ptr.vmem [resolvable:$true] %s14_s13 }
   0x9   :  { %13 = dma.hbm_to_smem %s4360_s0, 16, %s3579_s8, [#allocation3] }
   0xa   :  { %s3259_s14 = scalar_lea.vmem %s15_s13, 16  ;;  %p3264_p4 = scmp.lt.s32.totalorder %s15_s13, %s15_s13 }
   0xb   :  { %p3260_p3 = scmp.ne.s32.totalorder %s15_s13, %s3259_s14  ;;  %p3265_p5 = scmp.lt.s32.totalorder %s3259_s14, %s3259_s14 }
   0xd   :  { %p3266_p6 = por %p3265_p5, %p3264_p4 }
   0xf   :  { %p3267_p7 = pnand %p3266_p6, %p3260_p3 }
  0x11   :  { %3270 = shalt.err (!%p3267_p7)  }
  0x12   :  { %s3580_s15 = smov [#allocation5]  }
  0x13   :  { %17 = dma.vmem_to_smem %s15_s13, 16, %s3580_s15, [#allocation3] }
  0x14   :  { %3501 = dma.done.wait [#allocation3], 32 }
  0x15   :  { %3502 = vsyncadd [#allocation3], 4294967264 }
  0x16   :  { %19 = sfence }
  0x17   :  { %20 = vsyncpa [#allocation7], 0 }
  0x18   :  { %22 = vsyncpa [#allocation7 + $0x1], 0 }
  0x19   :  { %23 = vsyncpa [#allocation10], 0 }
  0x1a   :  { %25 = vsyncpa [#allocation10 + $0x1], 0 }
  0x1b   :  { %26 = vsyncpa [#allocation13], 0 }
  0x1c   :  { %27 = vsyncpa [#allocation8], 0 }
  0x1d   :  { %29 = vsyncpa [#allocation8 + $0x1], 0  ;;  %s3650_s0 = smov 0   ;;  %s3652_s1 = smov 0  }
  0x1e   :  { %s3654_s16 = smov 0   ;;  %s3656_s17 = smov 0  }
  0x1f   :  { %s3658_s18 = smov 0   ;;  %s3660_s19 = smov 0  }
  0x20   :  { %s3662_s20 = smov 0   ;;  %s3664_s21 = smov 0  }
  0x21   :  { %s3666_s22 = smov 0   ;;  %s3668_s23 = smov 0  }
  0x22   :  { %s3670_s24 = smov 0   ;;  %s3672_s25 = smov 0  }
  0x23   :  { %s3674_s26 = smov 0   ;;  %s3676_s27 = smov 0  }
  0x24 LB: > { %4405 = sst [smem:[#allocation26_spill]] %s3537_s17  ;;  %s3719_s28 = sadd.s32 4294967295, %s3577_s27   ;;  %s3577_s27 = sphi %s3676_s27, %s35_s27   ;;  %s3573_s26 = sphi %s3674_s26, %s4487_s26   ;;  %s3569_s25 = sphi %s3672_s25, %s4479_s25   ;;  %s3565_s24 = sphi %s3670_s24, %s4486_s24   ;;  %s3561_s23 = sphi %s3668_s23, %s4478_s23   ;;  %s3557_s22 = sphi %s3666_s22, %s4485_s22   ;;  %s3553_s21 = sphi %s3664_s21, %s4484_s21   ;;  %s3549_s20 = sphi %s3662_s20, %s4477_s20   ;;  %s3545_s19 = sphi %s3660_s19, %s4476_s19   ;;  %s3541_s18 = sphi %s3658_s18, %s4475_s18   ;;  %s3537_s17 = sphi %s3656_s17, %s4474_s17   ;;  %s3533_s16 = sphi %s3654_s16, %s4483_s16   ;;  %s3529_s1 = sphi %s3652_s1, %s4482_s1   ;;  %s3525_s0 = sphi %s3650_s0, %s4481_s0  }
  0x25   : > { %4406 = sst [smem:[#allocation27_spill]] %s3541_s18  ;;  %p133_p8 = scmp.ne.s32.totalorder %s3529_s1, %s3525_s0 }
  0x26   : > { %4407 = sst [smem:[#allocation28_spill]] %s3545_s19  ;;  %p4368_p9 = scmp.eq.s32.totalorder %s3719_s28, 0 }
  0x27   : > { %4408 = sst [smem:[#allocation29_spill]] %s3553_s21  ;;  %p2239_p10 = scmp.ge.s32.totalorder %s3577_s27, 1 }
  0x28   : > { %4409 = sst [smem:[#allocation30_spill]] %s3561_s23  ;;  %p212_p11 = scmp.lt.s32.totalorder %s3577_s27, 5 }
  0x29   : > { %4410 = sst [smem:[#allocation31_spill]] %s3565_s24  ;;  %p3727_p12 = por %p133_p8, %p4368_p9 }
  0x2a   : > { %4411 = sst [smem:[#allocation32_spill]] %s3569_s25  ;;  %p3731_p13 = pnand %p2239_p10, %p212_p11 }
  0x2b   : > { %4412 = sst [smem:[#allocation33_spill]] %s3719_s28  ;;  %s3581_s8 = smov [#allocation12]  }
  0x2c   : > { %s4413_s29 = scalar_select %p3727_p12, 1, 0 }
  0x2d   : > { %s4415_s30 = scalar_select %p3731_p13, 1, 0 }
  0x2e   : > { %4414 = sst [smem:[#allocation34_spill]] %s4413_s29  ;;  %s224_s9 = sshll.u32 %s3581_s8, 4  ;;  %s225_s9 = int_to_ptr.vmem [resolvable:$true] %s224_s9 }
  0x2f   : > { %p2870_p0 = pneg %p3731_p13  ;;  %s4417_s5 = sld [smem:[#allocation43_spill]] }
  0x31   : > { %p3739_p1 = pnand %p2870_p0, %p4368_p9 }
  0x33   : > { %p4390_p3 = pneg %p3739_p1 }
  0x35   : > { %s3271_s13 = scalar_lea.hbm %s4417_s5, 1024 }
  0x36   : > { %p3272_p2 = scmp.ne.s32.totalorder %s4417_s5, %s3271_s13  ;;  %p3278_p6 = scmp.lt.u32.totalorder %s3271_s13, %s4417_s5 }
  0x38   : > { %p3274_p4 = pnand %p4390_p3, %p3272_p2 }
  0x3a   : > { %p3275_p5 = pneg %p3274_p4 }
  0x3c   : > { %p3280_p7 = pnand %p3278_p6, %p3275_p5 }
  0x3e   : > { %3283 = shalt.err (!%p3280_p7)
}
  0x3f   : > { %s3284_s11 = scalar_lea.vmem %s225_s9, 1024  ;;  %p3292_p0 = scmp.lt.s32.totalorder %s225_s9, %s225_s9 }
  0x40   : > { %p3285_p8 = scmp.ne.s32.totalorder %s225_s9, %s3284_s11  ;;  %p3293_p9 = scmp.lt.s32.totalorder %s3284_s11, %s3284_s11 }
  0x42   : > { %p3287_p10 = pnand %p3285_p8, %p4390_p3  ;;  %p3294_p12 = por %p3293_p9, %p3292_p0 }
  0x44   : > { %p3288_p11 = pneg %p3287_p10 }
  0x46   : > { %p3295_p13 = pnand %p3294_p12, %p3288_p11 }
  0x48   : > { %3298 = shalt.err (!%p3295_p13)
}
  0x49   : > { %s4372_s12 = smov 64   ;;  %s4374_s13 = smov 4  }
  0x4a   : > { %2873 = dma.hbm_to_vmem [thread:$0]  (!%p3739_p1), %s4417_s5, 1024, %s225_s9, [#allocation13], %s4372_s12, %s4372_s12, %s4374_s13  }
  0x4b   : > { %p199_p9 = scmp.eq.s32.totalorder %s3719_s28, 3  ;;  %s44_s0 = sadd.s32 1, %s3569_s25 }
  0x4c   : > { %p45_p12 = scmp.ge.s32.totalorder %s44_s0, 2  ;;  %s47_s8 = sadd.s32 1, %s3573_s26 }
  0x4d   : > { %s2234_s11 = sadd.s32 4294967294, %s3577_s27   ;;  %p4389_p13 = scmp.eq.s32.totalorder %s3577_s27, 0 }
  0x4e   : > { %s4489_s0 = smov (%p45_p12, %s44_s0), 0  ;;  %s4491_s8 = smov (!%p45_p12, %s47_s8), %s3573_s26 }
  0x4f   : > { %4418 = sst [smem:[#allocation35_spill]] %s4489_s0  ;;  %s86_s7 = sadd.s32 1, %s3545_s19 }
  0x50   : > { %p99_p2 = scmp.ne.s32.totalorder %s3541_s18, %s3537_s17  ;;  %p49_p4 = scmp.ge.s32.totalorder %s4491_s8, 2 }
  0x51   : > { %p205_p5 = scmp.eq.s32.totalorder %s2234_s11, 3  ;;  %p93_p6 = scmp.ne.s32.totalorder %s3545_s19, %s3541_s18 }
  0x52   : > { %p4419_p7 = scmp.eq.s32.totalorder %s3719_s28, 0  ;;  %s4493_s8 = smov (%p49_p4, %s4491_s8), 0 }
  0x53   : > { %4422 = sst [smem:[#allocation37_spill]] %s4493_s8  ;;  %p3791_p10 = por %p199_p9, %p93_p6 }
  0x54   : > { %p3783_p8 = por %p99_p2, %p4419_p7  ;;  %p3795_p11 = por %p205_p5, %p99_p2 }
  0x55   : > { %s4423_s14 = scalar_select %p3791_p10, 1, 0 }
  0x56   : > { %s4420_s9 = scalar_select %p3783_p8, 1, 0 }
  0x57   : > { %4424 = sst [smem:[#allocation38_spill]] %s4423_s14  ;;  %s2236_s11 = sshll.u32 %s4493_s8, 1 }
  0x58   : > { %4421 = sst [smem:[#allocation36_spill]] %s4420_s9  ;;  %s3802_s12 = ssub.s32 %s3573_s26, %s4493_s8 }
  0x59   : > { %s4425_s15 = scalar_select %p3795_p11, 1, 0 }
  0x5a   : > { %p84_p0 = scmp.eq.s32.totalorder %s3802_s12, 0  ;;  %p95_p12 = por %p93_p6, %p4389_p13 }
  0x5b   : > { %4426 = sst [smem:[#allocation39_spill]] %s4425_s15  ;;  %s3808_s13 = sadd.s32 %s2236_s11, %s4489_s0 }
  0x5c   : > { %p4388_p4 = scmp.lt.s32.totalorder %s3577_s27, 4  ;;  %s275_s17 = sand.u32 1, %s3577_s27  }
  0x5d   : > { %s3812_s5 = scalar_select %p84_p0, %s3545_s19, %s86_s7  }
  0x5e   : > { %s277_s24 = sand.u32 1, %s3545_s19   ;;  %s2416_s23 = sshll.u32 %s3573_s26, 11 }
  0x5f   : > { %4427 = sst [smem:[#allocation40_spill]] %s3812_s5  ;;  %s2247_s14 = sshll.u32 %s277_s24, 7 }
  0x60   : > { %s4428_s3 = sld [smem:[#allocation42_spill]]  ;;  %s279_s8 = scalar_lea.vmem [#allocation9], %s2247_s14 }
  0x61   : > { %s286_s18 = sshll.u32 %s279_s8, 4  ;;  %p3826_p9 = pnand %p4388_p4, %p95_p12  ;;  %s3822_s18 = int_to_ptr.vmem [resolvable:$true] %s286_s18 }
  0x62   : > { %s3584_s24 = smov [#allocation14]  }
  0x63   : > { %s3830_s11 = sshll.u32 %s3584_s24, 4  ;;  %p3301_p5 = pneg %p3826_p9  ;;  %s238_s11 = int_to_ptr.vmem [resolvable:$true] %s3830_s11 }
  0x66   : > { %s3820_s15 = scalar_lea.hbm %s4428_s3, %s2416_s23  ;;  %s3832_s23 = scalar_lea.sflag [#allocation10], %s275_s17 }
  0x67   : > { %s3299_s29 = scalar_lea.hbm %s3820_s15, 2048  ;;  %s3304_s14 = scalar_lea.hbm %s4428_s3, 4096 }
  0x68   : > { %p3300_p2 = scmp.ne.s32.totalorder %s3820_s15, %s3299_s29  ;;  %p3305_p0 = scmp.lt.u32.totalorder %s3820_s15, %s4428_s3 }
  0x69   : > { %p3306_p12 = scmp.lt.u32.totalorder %s3304_s14, %s3299_s29  ;;  %p3308_p13 = scmp.lt.u32.totalorder %s3299_s29, %s3820_s15 }
  0x6a   : > { %p3302_p6 = pnand %p3301_p5, %p3300_p2 }
  0x6b   : > { %p3307_p4 = por %p3306_p12, %p3305_p0 }
  0x6c   : > { %p3303_p7 = pneg %p3302_p6 }
  0x6d   : > { %p3309_p3 = por %p3308_p13, %p3307_p4 }
  0x6f   : > { %p3310_p11 = pnand %p3309_p3, %p3303_p7 }
  0x71   : > { %3313 = shalt.err (!%p3310_p11)
}
  0x72   : > { %s3314_s17 = scalar_lea.vmem %s3822_s18, 2048  ;;  %s3585_s24 = smov [#allocation9]  }
  0x73   : > { %p3315_p2 = scmp.ne.s32.totalorder %s3822_s18, %s3314_s17  ;;  %s3319_s8 = sshll.u32 %s3585_s24, 4  ;;  %s3320_s8 = int_to_ptr.vmem [resolvable:$false] %s3319_s8 }
  0x74   : > { %s3321_s5 = scalar_lea.vmem %s3320_s8, 4096  ;;  %p3322_p8 = scmp.lt.s32.totalorder %s3822_s18, %s3320_s8 }
  0x75   : > { %p3317_p6 = pnand %p3315_p2, %p3301_p5  ;;  %p3323_p0 = scmp.lt.s32.totalorder %s3321_s5, %s3314_s17 }
  0x77   : > { %p3318_p10 = pneg %p3317_p6  ;;  %p3324_p12 = por %p3323_p0, %p3322_p8 }
  0x79   : > { %p3325_p13 = pnand %p3324_p12, %p3318_p10 }
  0x7b   : > { %3328 = shalt.err (!%p3325_p13)
}
  0x7c   : > { %s4430_s0 = smov 4   ;;  %s4431_s29 = smov 64  }
  0x7d   : > { %2885 = dma.hbm_to_vmem [thread:$0]  (!%p3826_p9), %s3820_s15, 2048, %s3822_s18, %s3832_s23, %s4431_s29, %s4431_s29, %s4430_s0  }
  0x7e   : > { %s4432_s6 = sld [smem:[#allocation44_spill]]  ;;  %p4433_p8 = pneg %p3739_p1 }
  0x84   : > { %s3329_s24 = scalar_lea.hbm %s4432_s6, 1024 }
  0x85   : > { %p3330_p3 = scmp.ne.s32.totalorder %s4432_s6, %s3329_s24  ;;  %p3336_p4 = scmp.lt.u32.totalorder %s3329_s24, %s4432_s6 }
  0x87   : > { %p3332_p10 = pnand %p3330_p3, %p4433_p8 }
  0x89   : > { %p3333_p11 = pneg %p3332_p10 }
  0x8b   : > { %p3338_p5 = pnand %p3336_p4, %p3333_p11 }
  0x8d   : > { %3341 = shalt.err (!%p3338_p5)
}
  0x8e   : > { %s3342_s18 = scalar_lea.vmem %s238_s11, 1024  ;;  %p4434_p7 = pmov %p4433_p8 }
  0x8f   : > { %p3343_p9 = scmp.ne.s32.totalorder %s238_s11, %s3342_s18  ;;  %p3350_p0 = scmp.lt.s32.totalorder %s238_s11, %s238_s11 }
  0x90   : > { %p3351_p12 = scmp.lt.s32.totalorder %s3342_s18, %s3342_s18 }
  0x91   : > { %p3345_p2 = pnand %p3343_p9, %p4434_p7 }
  0x92   : > { %p3352_p13 = por %p3351_p12, %p3350_p0 }
  0x93   : > { %p3346_p6 = pneg %p3345_p2 }
  0x95   : > { %p3353_p3 = pnand %p3352_p13, %p3346_p6 }
  0x97   : > { %3356 = shalt.err (!%p3353_p3)
}
  0x98   : > { %2876 = dma.hbm_to_vmem [thread:$0]  (!%p3739_p1), %s4432_s6, 1024, %s238_s11, [#allocation13], %s4431_s29, %s4431_s29, %s4430_s0  }
  0x99   : > { %s2235_s10 = sshll.u32 %s3573_s26, 1  ;;  %s56_s14 = sld [smem:[#allocation4 + %s3808_s13]] }
  0x9a   : > { %s114_s24 = sld [smem:[#allocation4 + %s3808_s13]]  ;;  %s3891_s17 = sadd.s32 %s3569_s25, %s2235_s10 }
  0x9b   : > { %s53_s8 = sld [smem:[#allocation4 + %s3891_s17]]  ;;  %p67_p8 = scmp.ne.s32.totalorder %s3557_s22, %s3553_s21 }
  0x9c   : > { %p73_p10 = scmp.ne.s32.totalorder %s3553_s21, %s3549_s20  ;;  %s111_s7 = sld [smem:[#allocation4 + %s3891_s17]] }
  0x9d   : > { %s251_s5 = sand.u32 1, %s3557_s22   ;;  %p4435_p11 = scmp.eq.s32.totalorder %s3577_s27, 0 }
  0x9e   : > { %p4436_p5 = scmp.eq.s32.totalorder %s3719_s28, 0  ;;  %s60_s13 = sadd.s32 1, %s3557_s22 }
  0x9f   : > { %p69_p4 = por %p4435_p11, %p67_p8  ;;  %s2243_s18 = sshll.u32 %s251_s5, 7 }
  0xa0   : > { %p3904_p1 = por %p4436_p5, %p73_p10  ;;  %p4439_p9 = scmp.lt.s32.totalorder %s3577_s27, 4 }
  0xa1   : > { %s57_s20 = ssub.s32 %s53_s8, %s56_s14  ;;  %s255_s25 = scalar_lea.vmem [#allocation6], %s2243_s18 }
  0xa2   : > { %s4437_s11 = scalar_select %p3904_p1, 1, 0 }
  0xa3   : > { %p3911_p7 = pnand %p4439_p9, %p69_p4  ;;  %p58_p2 = scmp.eq.s32.totalorder %s57_s20, 0 }
  0xa4   : > { %4438 = sst [smem:[#allocation41_spill]] %s4437_s11  ;;  %s116_s9 = ssub.s32 %s111_s7, %s114_s24 }
  0xa5   : > { %s2854_s10 = scalar_select %p69_p4, [#allocation4], [#allocation16] }
  0xa6   : > { %s3916_s3 = scalar_select %p58_p2, %s3557_s22, %s60_s13  }
  0xa7   : > { %s2855_s6 = scalar_select %p69_p4, %s3891_s17, 0 }
  0xa8   : > { %p4441_p6 = pmov %p4439_p9  ;;  %s265_s19 = sshll.u32 %s255_s25, 4  ;;  %s3931_s19 = int_to_ptr.vmem [resolvable:$true] %s265_s19 }
  0xa9   : > { %s117_s11 = sor.u32 %s116_s9, %s3802_s12  ;;  %s120_s21 = sadd.s32 1, %s3533_s16 }
  0xaa   : > { %s4495_s10 = smov (!%p4441_p6, %s2854_s10), [#allocation18]  ;;  %p4442_p0 = pmov %p4441_p6 }
  0xab   : > { %p118_p12 = scmp.eq.s32.totalorder %s117_s11, 0  ;;  %p127_p13 = scmp.ne.s32.totalorder %s3533_s16, %s3529_s1 }
  0xac   : > { %s4497_s6 = smov (!%p4442_p0, %s2855_s6), 0  ;;  %s298_s14 = sand.u32 1, %s3533_s16  }
  0xad   : > { %s258_s28 = sld [smem:[%s4495_s10 + %s4497_s6]]  ;;  %p4443_p3 = pmov %p4435_p11 }
  0xae   : > { %s3929_s24 = scalar_select %p118_p12, %s3533_s16, %s120_s21  }
  0xaf   : > { %p3935_p8 = por %p127_p13, %p4443_p3  ;;  %s3944_s12 = sshll.u32 %s298_s14, 8 }
  0xb0   : > { %s3946_s21 = scalar_lea.sflag [#allocation7], %s251_s5  ;;  %p3359_p11 = pneg %p3911_p7 }
  0xb1   : > { %s3362_s20 = scalar_lea.hbm %s4361_s2, 4096 }
  0xb3   : > { %s2415_s7 = sshll.u32 %s258_s28, 11 }
  0xb4   : > { %s3942_s6 = scalar_lea.hbm %s4361_s2, %s2415_s7 }
  0xb5   : > { %s3357_s11 = scalar_lea.hbm %s3942_s6, 2048  ;;  %p3363_p9 = scmp.lt.u32.totalorder %s3942_s6, %s4361_s2 }
  0xb6   : > { %p3358_p10 = scmp.ne.s32.totalorder %s3942_s6, %s3357_s11  ;;  %p3364_p2 = scmp.lt.u32.totalorder %s3362_s20, %s3357_s11 }
  0xb7   : > { %p3366_p0 = scmp.lt.u32.totalorder %s3357_s11, %s3942_s6 }
  0xb8   : > { %p3360_p4 = pnand %p3359_p11, %p3358_p10  ;;  %p3365_p6 = por %p3364_p2, %p3363_p9 }
  0xba   : > { %p3361_p5 = pneg %p3360_p4  ;;  %p3367_p12 = por %p3366_p0, %p3365_p6 }
  0xbc   : > { %p3368_p13 = pnand %p3367_p12, %p3361_p5 }
  0xbe   : > { %3371 = shalt.err (!%p3368_p13)
}
  0xbf   : > { %s3372_s5 = scalar_lea.vmem %s3931_s19, 2048  ;;  %s3586_s14 = smov [#allocation6]  }
  0xc0   : > { %p3373_p3 = scmp.ne.s32.totalorder %s3931_s19, %s3372_s5  ;;  %s3377_s7 = sshll.u32 %s3586_s14, 4  ;;  %s3378_s7 = int_to_ptr.vmem [resolvable:$false] %s3377_s7 }
  0xc1   : > { %s3379_s13 = scalar_lea.vmem %s3378_s7, 4096  ;;  %p3380_p1 = scmp.lt.s32.totalorder %s3931_s19, %s3378_s7 }
  0xc2   : > { %p3375_p10 = pnand %p3373_p3, %p3359_p11  ;;  %p3381_p9 = scmp.lt.s32.totalorder %s3379_s13, %s3372_s5 }
  0xc4   : > { %p3376_p4 = pneg %p3375_p10  ;;  %p3382_p2 = por %p3381_p9, %p3380_p1 }
  0xc6   : > { %p3383_p6 = pnand %p3382_p2, %p3376_p4 }
  0xc8   : > { %3386 = shalt.err (!%p3383_p6)
}
  0xc9   : > { %2882 = dma.hbm_to_vmem [thread:$0]  (!%p3911_p7), %s3942_s6, 2048, %s3931_s19, %s3946_s21, %s4431_s29, %s4431_s29, %s4430_s0  }
  0xca   : > { %s2858_s25 = scalar_select %p3935_p8, [#allocation4], [#allocation17] }
  0xcb   : > { %s4499_s17 = smov (!%p3935_p8, %s3891_s17), 0  ;;  %p4445_p1 = scmp.lt.s32.totalorder %s3577_s27, 4 }
  0xcc   : > { %s300_s28 = scalar_lea.vmem [#allocation11], %s3944_s12  ;;  %s2417_s19 = sshll.u32 %s3573_s26, 7 }
  0xcd   : > { %s4501_s25 = smov (!%p4445_p1, %s2858_s25), [#allocation19]  ;;  %p4446_p11 = pmov %p4445_p1 }
  0xce   : > { %p4447_p5 = pmov %p4445_p1  ;;  %s313_s18 = sshll.u32 %s300_s28, 4  ;;  %s3996_s18 = int_to_ptr.vmem [resolvable:$true] %s313_s18 }
  0xcf   : > { %s4503_s17 = smov (!%p4446_p11, %s4499_s17), 0  ;;  %s3392_s10 = scalar_lea.hbm %s4363_s4, 16384 }
  0xd0   : > { %p3990_p0 = pnand %p4447_p5, %p3935_p8  ;;  %s303_s11 = sld [smem:[%s4501_s25 + %s4503_s17]] }
  0xd2   : > { %p3389_p8 = pneg %p3990_p0 }
  0xd6   : > { %s2253_s0 = sshll.u32 %s303_s11, 1 }
  0xd7   : > { %s310_s29 = sadd.s32 %s2417_s19, %s2253_s0 }
  0xd8   : > { %s2255_s6 = sshll.u32 %s310_s29, 6 }
  0xd9   : > { %s4001_s8 = scalar_lea.hbm %s4363_s4, %s2255_s6 }
  0xda   : > { %s3387_s9 = scalar_lea.hbm %s4001_s8, 4096  ;;  %p3393_p3 = scmp.lt.u32.totalorder %s4001_s8, %s4363_s4 }
  0xdb   : > { %p3388_p7 = scmp.ne.s32.totalorder %s4001_s8, %s3387_s9  ;;  %p3394_p10 = scmp.lt.u32.totalorder %s3392_s10, %s3387_s9 }
  0xdc   : > { %p3396_p9 = scmp.lt.u32.totalorder %s3387_s9, %s4001_s8 }
  0xdd   : > { %p3390_p12 = pnand %p3389_p8, %p3388_p7  ;;  %p3395_p4 = por %p3394_p10, %p3393_p3 }
  0xdf   : > { %p3391_p13 = pneg %p3390_p12  ;;  %p3397_p2 = por %p3396_p9, %p3395_p4 }
  0xe1   : > { %p3398_p6 = pnand %p3397_p2, %p3391_p13 }
  0xe3   : > { %3401 = shalt.err (!%p3398_p6)
}
  0xe4   : > { %s3402_s7 = scalar_lea.vmem %s3996_s18, 4096  ;;  %s3587_s13 = smov [#allocation11]  }
  0xe5   : > { %p3403_p1 = scmp.ne.s32.totalorder %s3996_s18, %s3402_s7  ;;  %s3407_s25 = sshll.u32 %s3587_s13, 4  ;;  %s3408_s25 = int_to_ptr.vmem [resolvable:$false] %s3407_s25 }
  0xe6   : > { %s3409_s11 = scalar_lea.vmem %s3408_s25, 8192  ;;  %p3410_p7 = scmp.lt.s32.totalorder %s3996_s18, %s3408_s25 }
  0xe7   : > { %p3405_p11 = pnand %p3403_p1, %p3389_p8  ;;  %p3411_p12 = scmp.lt.s32.totalorder %s3409_s11, %s3402_s7 }
  0xe9   : > { %p3406_p5 = pneg %p3405_p11  ;;  %p3412_p3 = por %p3411_p12, %p3410_p7 }
  0xeb   : > { %p3413_p10 = pnand %p3412_p3, %p3406_p5 }
  0xed   : > { %3416 = shalt.err (!%p3413_p10)
}
  0xee   : > { %s3588_s28 = smov 256   ;;  %s3589_s19 = smov 128  }
  0xef   : > { %s3590_s0 = smov 8   ;;  %p4449_p8 = scmp.ne.s32.totalorder %s4415_s30, 0 }
  0xf0   : > { %2890 = dma.hbm_to_vmem [thread:$0]  (!%p3990_p0), %s4001_s8, 4096, %s3996_s18, %s3832_s23, %s3588_s28, %s3589_s19, %s3590_s0  }
  0xf1   : > { %325 = sbr.rel (%p4449_p8) target bundleno = 1001 (0x3e9), region = 40  ;;  %s4450_s29 = sld [smem:[#allocation29_spill]] (!%p4449_p8) }
  0xf2   : > { %s4451_s6 = sld [smem:[#allocation41_spill]] (!%p4449_p8) }
  0xf7   : > { %s327_s21 = sand.u32 (!%p4449_p8), 1, %s4450_s29  }
  0xf8   : > { %s2257_s20 = sshll.u32 %s327_s21, 7  ;;  %s328_s9 = scalar_lea.sflag [#allocation7], %s327_s21 }
  0xf9   : > { %s4032_s17 = scalar_lea.vmem [#allocation6], %s2257_s20  ;;  %p4452_p13 = scmp.ne.s32.totalorder %s4451_s6, 0 }
  0xfb   : > { %3504 = dma.done.wait (%p4452_p13), %s328_s9, 2048  }
  0xfc   : > { %3506 = vsyncadd (%p4452_p13), %s328_s9, 4294965248  ;;  %s4453_s12 = sld [smem:[#allocation33_spill]]  ;;  %s4454_s10 = sld [smem:[#allocation27_spill]] }
  0xfd   : > { %s4455_s15 = sld [smem:[#allocation36_spill]] }
 0x102   : > { %s336_s23 = sand.u32 1, %s4453_s12   ;;  %s338_s18 = sand.u32 1, %s4454_s10  }
 0x103   : > { %s2258_s30 = sshll.u32 %s338_s18, 7  ;;  %s337_s8 = scalar_lea.sflag [#allocation10], %s336_s23 }
 0x104   : > { %s4042_s5 = scalar_lea.vmem [#allocation9], %s2258_s30  ;;  %p4456_p0 = scmp.ne.s32.totalorder %s4455_s15, 0 }
 0x106   : > { %3508 = dma.done.wait (%p4456_p0), %s337_s8, 2048  }
 0x107   : > { %3510 = vsyncadd (%p4456_p0), %s337_s8, 4294965248  ;;  %s4457_s14 = sld [smem:[#allocation34_spill]]  ;;  %s347_s7 = sand.u32 1, %s3529_s1  }
 0x108   : > { %s2259_s13 = sshll.u32 %s347_s7, 8 }
 0x109   : > { %s4049_s25 = scalar_lea.vmem [#allocation11], %s2259_s13 }
 0x10d   : > { %p4458_p4 = scmp.ne.s32.totalorder %s4457_s14, 0 }
 0x10f   : > { %3512 = dma.done.wait (%p4458_p4), %s337_s8, 4096  }
 0x110   : > { %3514 = vsyncadd (%p4458_p4), %s337_s8, 4294963200  ;;  %p4459_p9 = scmp.eq.s32.totalorder %s4453_s12, 0 }
 0x112   : > { %3516 = dma.done.wait (%p4459_p9), [#allocation13], 2048   ;;  %p4460_p2 = pmov %p4459_p9 }
 0x113   : > { %s4059_s11 = scalar_lea.vmem [#allocation15], %s2258_s30  ;;  %s4461_s28 = sld [smem:[#allocation30_spill]] }
 0x114   : > { %3518 = vsyncadd (%p4460_p2), [#allocation13], 4294965248 }
 0x119   : > { %p2263_p6 = scmp.ne.s32.totalorder %s4461_s28, 0 }
 0x11a   : > { %v3591_v0 = vmov (!%p2263_p6), 0.0  }
 0x11b   : > { %409 = sbr.rel (%p2263_p6) target bundleno = 299 (0x12b), region = 64  ;;  %410 = vst [vmem:[#allocation2] sm:$0xff] (!%p2263_p6), %v3591_v0  ;;  %411 = vst [vmem:[#allocation2 + $0x8] sm:$0xff] (!%p2263_p6), %v3591_v0 }
 0x11c   : > { %412 = vst [vmem:[#allocation2 + $0x10] sm:$0xff] (!%p2263_p6), %v3591_v0  ;;  %413 = vst [vmem:[#allocation2 + $0x18] sm:$0xff] (!%p2263_p6), %v3591_v0 }
 0x11d   : > { %414 = vst [vmem:[#allocation2 + $0x20] sm:$0xff] (!%p2263_p6), %v3591_v0  ;;  %415 = vst [vmem:[#allocation2 + $0x28] sm:$0xff] (!%p2263_p6), %v3591_v0 }
 0x11e   : > { %416 = vst [vmem:[#allocation2 + $0x30] sm:$0xff] (!%p2263_p6), %v3591_v0  ;;  %417 = vst [vmem:[#allocation2 + $0x38] sm:$0xff] (!%p2263_p6), %v3591_v0 }
 0x11f   : > { %418 = vst [vmem:[#allocation2 + $0x40] sm:$0xff] (!%p2263_p6), %v3591_v0  ;;  %419 = vst [vmem:[#allocation2 + $0x48] sm:$0xff] (!%p2263_p6), %v3591_v0 }
 0x120   : > { %420 = vst [vmem:[#allocation2 + $0x50] sm:$0xff] (!%p2263_p6), %v3591_v0  ;;  %421 = vst [vmem:[#allocation2 + $0x58] sm:$0xff] (!%p2263_p6), %v3591_v0 }
 0x121   : > { %422 = vst [vmem:[#allocation2 + $0x60] sm:$0xff] (!%p2263_p6), %v3591_v0  ;;  %423 = vst [vmem:[#allocation2 + $0x68] sm:$0xff] (!%p2263_p6), %v3591_v0 }
 0x122   : > { %424 = vst [vmem:[#allocation2 + $0x70] sm:$0xff] %v3591_v0  ;;  %425 = vst [vmem:[#allocation2 + $0x78] sm:$0xff] %v3591_v0 }
 0x123   : > { %426 = vst [vmem:[#allocation2 + $0x80] sm:$0xff] %v3591_v0  ;;  %427 = vst [vmem:[#allocation2 + $0x88] sm:$0xff] %v3591_v0 }
 0x124   : > { %428 = vst [vmem:[#allocation2 + $0x90] sm:$0xff] %v3591_v0  ;;  %429 = vst [vmem:[#allocation2 + $0x98] sm:$0xff] %v3591_v0 }
 0x125   : > { %430 = vst [vmem:[#allocation2 + $0xa0] sm:$0xff] %v3591_v0  ;;  %431 = vst [vmem:[#allocation2 + $0xa8] sm:$0xff] %v3591_v0 }
 0x126   : > { %432 = vst [vmem:[#allocation2 + $0xb0] sm:$0xff] %v3591_v0  ;;  %433 = vst [vmem:[#allocation2 + $0xb8] sm:$0xff] %v3591_v0 }
 0x127   : > { %434 = vst [vmem:[#allocation2 + $0xc0] sm:$0xff] %v3591_v0  ;;  %435 = vst [vmem:[#allocation2 + $0xc8] sm:$0xff] %v3591_v0 }
 0x128   : > { %436 = vst [vmem:[#allocation2 + $0xd0] sm:$0xff] %v3591_v0  ;;  %437 = vst [vmem:[#allocation2 + $0xd8] sm:$0xff] %v3591_v0 }
 0x129   : > { %438 = vst [vmem:[#allocation2 + $0xe0] sm:$0xff] %v3591_v0  ;;  %439 = vst [vmem:[#allocation2 + $0xe8] sm:$0xff] %v3591_v0 }
 0x12a   : > { %440 = vst [vmem:[#allocation2 + $0xf0] sm:$0xff] %v3591_v0  ;;  %441 = vst [vmem:[#allocation2 + $0xf8] sm:$0xff] %v3591_v0 }
 0x12b PF: > { %s4462_s19 = sld [smem:[#allocation31_spill]]  ;;  %s4463_s29 = sld [smem:[#allocation30_spill]] }
 0x131   : > { %s442_s0 = sld [smem:[#allocation5 + %s4462_s19]] }
 0x137   : > { %p2264_p1 = scmp.ge.s32.totalorder %s4463_s29, %s442_s0 }
 0x138   : > { %v3025_v1 = vld [vmem:[%s4032_s17 + $0x40] sm:$0xff] (!%p2264_p1)   ;;  %v3027_v3 = vld [vmem:[%s4032_s17 + $0x48] sm:$0xff] (!%p2264_p1)   ;;  %v3029_v5 = vld [vmem:[%s4032_s17 + $0x50] sm:$0xff] (!%p2264_p1)  }
 0x139   : > { %446 = sbr.rel (%p2264_p1) target bundleno = 621 (0x26d), region = 68  ;;  %v3026_v2 = vld [vmem:[%s4032_s17] sm:$0xff] (!%p2264_p1)   ;;  %2546 = vmatprep.subr.bf16.mxu0 (!%p2264_p1), %v3025_v1  ;;  %2802 = vmatprep.subr.bf16.mxu1 (!%p2264_p1), %v3025_v1  ;;  %v3028_v4 = vld [vmem:[%s4032_s17 + $0x8] sm:$0xff] (!%p2264_p1)   ;;  %v3030_v6 = vld [vmem:[%s4032_s17 + $0x10] sm:$0xff] (!%p2264_p1)  }
 0x13a   : > { %2547 = vmatpush3.bf16.msra.mxu0 (!%p2264_p1), %v3026_v2  ;;  %2810 = vmatpush3.bf16.msra.mxu1 (!%p2264_p1), %v3026_v2  ;;  %v3031_v7 = vld [vmem:[%s4032_s17 + $0x58] sm:$0xff] (!%p2264_p1)   ;;  %v3033_v9 = vld [vmem:[%s4032_s17 + $0x60] sm:$0xff] (!%p2264_p1)   ;;  %v3035_v11 = vld [vmem:[%s4032_s17 + $0x68] sm:$0xff] (!%p2264_p1)  }
 0x13b   : > { %2548 = vmatprep.subr.bf16.mxu0 (!%p2264_p1), %v3027_v3  ;;  %2803 = vmatprep.subr.bf16.mxu1 (!%p2264_p1), %v3027_v3  ;;  %v3032_v8 = vld [vmem:[%s4032_s17 + $0x18] sm:$0xff] (!%p2264_p1)   ;;  %v3034_v10 = vld [vmem:[%s4032_s17 + $0x20] sm:$0xff] (!%p2264_p1)   ;;  %v3036_v14 = vld [vmem:[%s4032_s17 + $0x28] sm:$0xff] (!%p2264_p1)  }
 0x13c   : > { %v3043_v12 = vld [vmem:[%s4049_s25 + $0x4] ss:$8 sps:$4 sm:$0xff] (!%p2264_p1)   ;;  %v3037_v15 = vld [vmem:[%s4032_s17 + $0x70] sm:$0xff] (!%p2264_p1)   ;;  %v3039_v17 = vld [vmem:[%s4032_s17 + $0x78] sm:$0xff] (!%p2264_p1)  }
 0x13d   : > { %v3046_v13 = vld [vmem:[%s4049_s25 + $0x84] ss:$8 sps:$4 sm:$0xff] (!%p2264_p1)   ;;  %831 = vmatprep.mubr.bf16.mxu0 (!%p2264_p1), %v3043_v12  ;;  %v3038_v16 = vld [vmem:[%s4032_s17 + $0x30] sm:$0xff] (!%p2264_p1)   ;;  %v3040_v18 = vld [vmem:[%s4032_s17 + $0x38] sm:$0xff] (!%p2264_p1)  }
 0x13e   : > { %2549 = vmatpush3.bf16.msra.mxu0 (!%p2264_p1), %v3028_v4  ;;  %2811 = vmatpush3.bf16.msra.mxu1 (!%p2264_p1), %v3028_v4  ;;  %v3041_v19 = vld [vmem:[%s4049_s25] ss:$8 sps:$4 sm:$0xff] (!%p2264_p1)   ;;  %v3047_v21 = vld [vmem:[%s4049_s25 + $0x14] ss:$8 sps:$4 sm:$0xff] (!%p2264_p1)   ;;  %v3051_v23 = vld [vmem:[%s4049_s25 + $0x10] ss:$8 sps:$4 sm:$0xff] (!%p2264_p1)  }
 0x13f   : > { %2550 = vmatprep.subr.bf16.mxu0 (!%p2264_p1), %v3029_v5  ;;  %2804 = vmatprep.subr.bf16.mxu1 (!%p2264_p1), %v3029_v5  ;;  %v3044_v20 = vld [vmem:[%s4049_s25 + $0x80] ss:$8 sps:$4 sm:$0xff] (!%p2264_p1)   ;;  %v3049_v22 = vld [vmem:[%s4049_s25 + $0x94] ss:$8 sps:$4 sm:$0xff] (!%p2264_p1)   ;;  %v3052_v24 = vld [vmem:[%s4049_s25 + $0x90] ss:$8 sps:$4 sm:$0xff] (!%p2264_p1)  }
 0x140   : > { %895 = vmatprep.mubr.bf16.mxu1 %v3046_v13  ;;  %v3053_v25 = vld [vmem:[%s4049_s25 + $0x24] ss:$8 sps:$4 sm:$0xff]   ;;  %v3057_v27 = vld [vmem:[%s4049_s25 + $0x20] ss:$8 sps:$4 sm:$0xff]   ;;  %v3059_v29 = vld [vmem:[%s4049_s25 + $0x34] ss:$8 sps:$4 sm:$0xff]  }
 0x141   : > { %v3055_v26 = vld [vmem:[%s4049_s25 + $0xa4] ss:$8 sps:$4 sm:$0xff]   ;;  %v3058_v28 = vld [vmem:[%s4049_s25 + $0xa0] ss:$8 sps:$4 sm:$0xff]   ;;  %v3061_v30 = vld [vmem:[%s4049_s25 + $0xb4] ss:$8 sps:$4 sm:$0xff]  }
 0x142   : > { %2551 = vmatpush3.bf16.msra.mxu0 %v3030_v6  ;;  %2812 = vmatpush3.bf16.msra.mxu1 %v3030_v6  ;;  %v3063_v31 = vld [vmem:[%s4049_s25 + $0x30] ss:$8 sps:$4 sm:$0xff]   ;;  %v3065_v33 = vld [vmem:[%s4049_s25 + $0x44] ss:$8 sps:$4 sm:$0xff]   ;;  %v3069_v35 = vld [vmem:[%s4049_s25 + $0x40] ss:$8 sps:$4 sm:$0xff]  }
 0x143   : > { %2552 = vmatprep.subr.bf16.mxu0 %v3031_v7  ;;  %2805 = vmatprep.subr.bf16.mxu1 %v3031_v7  ;;  %v3064_v32 = vld [vmem:[%s4049_s25 + $0xb0] ss:$8 sps:$4 sm:$0xff]   ;;  %v3067_v34 = vld [vmem:[%s4049_s25 + $0xc4] ss:$8 sps:$4 sm:$0xff]   ;;  %v3070_v36 = vld [vmem:[%s4049_s25 + $0xc0] ss:$8 sps:$4 sm:$0xff]  }
 0x144   : > { %v3071_v37 = vld [vmem:[%s4049_s25 + $0x54] ss:$8 sps:$4 sm:$0xff]   ;;  %v3075_v39 = vld [vmem:[%s4049_s25 + $0x50] ss:$8 sps:$4 sm:$0xff]   ;;  %v3077_v41 = vld [vmem:[%s4049_s25 + $0x64] ss:$8 sps:$4 sm:$0xff]  }
 0x145   : > { %v3073_v38 = vld [vmem:[%s4049_s25 + $0xd4] ss:$8 sps:$4 sm:$0xff]   ;;  %v3076_v40 = vld [vmem:[%s4049_s25 + $0xd0] ss:$8 sps:$4 sm:$0xff]   ;;  %v3079_v42 = vld [vmem:[%s4049_s25 + $0xe4] ss:$8 sps:$4 sm:$0xff]  }
 0x146   : > { %2553 = vmatpush3.bf16.msra.mxu0 %v3032_v8  ;;  %2813 = vmatpush3.bf16.msra.mxu1 %v3032_v8  ;;  %v3081_v43 = vld [vmem:[%s4049_s25 + $0x60] ss:$8 sps:$4 sm:$0xff]   ;;  %v3083_v45 = vld [vmem:[%s4049_s25 + $0x74] ss:$8 sps:$4 sm:$0xff]   ;;  %v3087_v47 = vld [vmem:[%s4049_s25 + $0x70] ss:$8 sps:$4 sm:$0xff]  }
 0x147   : > { %2554 = vmatprep.subr.bf16.mxu0 %v3033_v9  ;;  %2806 = vmatprep.subr.bf16.mxu1 %v3033_v9  ;;  %v3082_v44 = vld [vmem:[%s4049_s25 + $0xe0] ss:$8 sps:$4 sm:$0xff]   ;;  %v3085_v46 = vld [vmem:[%s4049_s25 + $0xf4] ss:$8 sps:$4 sm:$0xff]   ;;  %v3088_v48 = vld [vmem:[%s4049_s25 + $0xf0] ss:$8 sps:$4 sm:$0xff]  }
 0x148   : > { %v447_v51 = vld [vmem:[#allocation2] sm:$0xff]  ;;  %v448_v59 = vld [vmem:[#allocation2 + $0x8] sm:$0xff]  ;;  %v449_v7 = vld [vmem:[#allocation2 + $0x10] sm:$0xff] }
 0x149   : > { %v463_v53 = vld [vmem:[#allocation2 + $0x80] sm:$0xff]  ;;  %v464_v61 = vld [vmem:[#allocation2 + $0x88] sm:$0xff]  ;;  %v465_v9 = vld [vmem:[#allocation2 + $0x90] sm:$0xff] }
 0x14a   : > { %2555 = vmatpush3.bf16.msra.mxu0 %v3034_v10  ;;  %2814 = vmatpush3.bf16.msra.mxu1 %v3034_v10 }
 0x14b   : > { %2556 = vmatprep.subr.bf16.mxu0 %v3035_v11  ;;  %2807 = vmatprep.subr.bf16.mxu1 %v3035_v11 }
 0x14e   : > { %2557 = vmatpush3.bf16.msra.mxu0 %v3036_v14  ;;  %2815 = vmatpush3.bf16.msra.mxu1 %v3036_v14 }
 0x14f   : > { %2558 = vmatprep.subr.bf16.mxu0 %v3037_v15  ;;  %2808 = vmatprep.subr.bf16.mxu1 %v3037_v15  ;;  %v450_v15 = vld [vmem:[#allocation2 + $0x18] sm:$0xff] }
 0x152   : > { %2559 = vmatpush3.bf16.msra.mxu0 %v3038_v16  ;;  %2816 = vmatpush3.bf16.msra.mxu1 %v3038_v16 }
 0x153   : > { %2560 = vmatprep.subr.bf16.mxu0 %v3039_v17  ;;  %2809 = vmatprep.subr.bf16.mxu1 %v3039_v17  ;;  %v466_v17 = vld [vmem:[#allocation2 + $0x98] sm:$0xff] }
 0x156   : > { %2561 = vmatpush3.bf16.msra.mxu0 %v3040_v18  ;;  %2817 = vmatpush3.bf16.msra.mxu1 %v3040_v18 }
 0x159   : > { %832 = vmatmul.mubr.bf16.vlgmr.msra.gmra.mrb[0].mxu0 %v3041_v19  ;;  %896 = vmatmul.mubr.bf16.vlgmr.msra.gmra.mrb[0].mxu1 %v3044_v20 }
 0x15a   : > { %839 = vmatprep.mubr.bf16.mxu0 %v3047_v21  ;;  %903 = vmatprep.mubr.bf16.mxu1 %v3049_v22 }
 0x161   : > { %840 = vmatmul.mubr.bf16.gmra.mrb[4].mxu0 %v3051_v23  ;;  %904 = vmatmul.mubr.bf16.gmra.mrb[4].mxu1 %v3052_v24 }
 0x162   : > { %847 = vmatprep.mubr.bf16.mxu0 %v3053_v25  ;;  %911 = vmatprep.mubr.bf16.mxu1 %v3055_v26 }
 0x169   : > { %848 = vmatmul.mubr.bf16.gmra.mrb[8].mxu0 %v3057_v27  ;;  %912 = vmatmul.mubr.bf16.gmra.mrb[8].mxu1 %v3058_v28  ;;  %v451_v27 = vld [vmem:[#allocation2 + $0x20] sm:$0xff] }
 0x16a   : > { %855 = vmatprep.mubr.bf16.mxu0 %v3059_v29  ;;  %919 = vmatprep.mubr.bf16.mxu1 %v3061_v30  ;;  %v467_v29 = vld [vmem:[#allocation2 + $0xa0] sm:$0xff] }
 0x171   : > { %856 = vmatmul.mubr.bf16.gmra.mrb[12].mxu0 %v3063_v31  ;;  %920 = vmatmul.mubr.bf16.gmra.mrb[12].mxu1 %v3064_v32 }
 0x172   : > { %863 = vmatprep.mubr.bf16.mxu0 %v3065_v33  ;;  %927 = vmatprep.mubr.bf16.mxu1 %v3067_v34 }
 0x179   : > { %864 = vmatmul.mubr.bf16.gmra.mrb[16].mxu0 %v3069_v35  ;;  %928 = vmatmul.mubr.bf16.gmra.mrb[16].mxu1 %v3070_v36  ;;  %v452_v35 = vld [vmem:[#allocation2 + $0x28] sm:$0xff] }
 0x17a   : > { %871 = vmatprep.mubr.bf16.mxu0 %v3071_v37  ;;  %935 = vmatprep.mubr.bf16.mxu1 %v3073_v38  ;;  %v468_v37 = vld [vmem:[#allocation2 + $0xa8] sm:$0xff] }
 0x181   : > { %872 = vmatmul.mubr.bf16.gmra.mrb[20].mxu0 %v3075_v39  ;;  %936 = vmatmul.mubr.bf16.gmra.mrb[20].mxu1 %v3076_v40 }
 0x182   : > { %879 = vmatprep.mubr.bf16.mxu0 %v3077_v41  ;;  %943 = vmatprep.mubr.bf16.mxu1 %v3079_v42 }
 0x189   : > { %880 = vmatmul.mubr.bf16.gmra.mrb[24].mxu0 %v3081_v43  ;;  %944 = vmatmul.mubr.bf16.gmra.mrb[24].mxu1 %v3082_v44 }
 0x18a   : > { %887 = vmatprep.mubr.bf16.mxu0 %v3083_v45  ;;  %951 = vmatprep.mubr.bf16.mxu1 %v3085_v46 }
 0x191   : > { %888 = vmatmul.mubr.bf16.gmra.mrb[28].mxu0 %v3087_v47  ;;  %952 = vmatmul.mubr.bf16.gmra.mrb[28].mxu1 %v3088_v48  ;;  %v453_v47 = vld [vmem:[#allocation2 + $0x30] sm:$0xff] }
 0x22c   : > { %v2562_v49 = vpop.f32.mrb[0].mxu0  ;;  %v2610_v50 = vpop.f32.mrb[0].mxu1 }
 0x22d   : > { %v2563_v52 = vpop.f32.mrb[1].mxu0  ;;  %v2611_v54 = vpop.f32.mrb[1].mxu1 }
 0x22e   : > { %v2564_v55 = vadd.f32 %v2563_v52, %v2562_v49  ;;  %v2612_v56 = vadd.f32 %v2611_v54, %v2610_v50  ;;  %v2565_v57 = vpop.f32.mrb[2].mxu0  ;;  %v2613_v58 = vpop.f32.mrb[2].mxu1  ;;  %v469_v49 = vld [vmem:[#allocation2 + $0xb0] sm:$0xff] }
 0x22f   : > { %v2566_v60 = vpop.f32.mrb[3].mxu0  ;;  %v2614_v62 = vpop.f32.mrb[3].mxu1 }
 0x230   : > { %v960_v63 = vadd.f32 %v2564_v55, %v447_v51  ;;  %v976_v0 = vadd.f32 %v2612_v56, %v463_v53  ;;  %v2567_v1 = vadd.f32 %v2566_v60, %v2565_v57  ;;  %v2615_v2 = vadd.f32 %v2614_v62, %v2613_v58  ;;  %v454_v55 = vld [vmem:[#allocation2 + $0x38] sm:$0xff] }
 0x231   : > { %v470_v57 = vld [vmem:[#allocation2 + $0xb8] sm:$0xff] }
 0x232   : > { %992 = vst [vmem:[#allocation2] sm:$0xff] %v960_v63  ;;  %1008 = vst [vmem:[#allocation2 + $0x80] sm:$0xff] %v976_v0  ;;  %v961_v3 = vadd.f32 %v2567_v1, %v448_v59  ;;  %v977_v4 = vadd.f32 %v2615_v2, %v464_v61 }
 0x234   : > { %993 = vst [vmem:[#allocation2 + $0x8] sm:$0xff] %v961_v3  ;;  %1009 = vst [vmem:[#allocation2 + $0x88] sm:$0xff] %v977_v4  ;;  %v2568_v5 = vpop.f32.mrb[4].mxu0  ;;  %v2616_v6 = vpop.f32.mrb[4].mxu1  ;;  %v455_v3 = vld [vmem:[#allocation2 + $0x40] sm:$0xff] }
 0x235   : > { %v2569_v8 = vpop.f32.mrb[5].mxu0  ;;  %v2617_v10 = vpop.f32.mrb[5].mxu1 }
 0x236   : > { %v2570_v11 = vadd.f32 %v2569_v8, %v2568_v5  ;;  %v2618_v12 = vadd.f32 %v2617_v10, %v2616_v6  ;;  %v2571_v13 = vpop.f32.mrb[6].mxu0  ;;  %v2619_v14 = vpop.f32.mrb[6].mxu1  ;;  %v471_v5 = vld [vmem:[#allocation2 + $0xc0] sm:$0xff] }
 0x237   : > { %v2572_v16 = vpop.f32.mrb[7].mxu0  ;;  %v2620_v18 = vpop.f32.mrb[7].mxu1 }
 0x238   : > { %v962_v19 = vadd.f32 %v2570_v11, %v449_v7  ;;  %v978_v20 = vadd.f32 %v2618_v12, %v465_v9  ;;  %v2573_v21 = vadd.f32 %v2572_v16, %v2571_v13  ;;  %v2621_v22 = vadd.f32 %v2620_v18, %v2619_v14  ;;  %v456_v11 = vld [vmem:[#allocation2 + $0x48] sm:$0xff] }
 0x239   : > { %v472_v13 = vld [vmem:[#allocation2 + $0xc8] sm:$0xff] }
 0x23a   : > { %994 = vst [vmem:[#allocation2 + $0x10] sm:$0xff] %v962_v19  ;;  %1010 = vst [vmem:[#allocation2 + $0x90] sm:$0xff] %v978_v20  ;;  %v963_v23 = vadd.f32 %v2573_v21, %v450_v15  ;;  %v979_v24 = vadd.f32 %v2621_v22, %v466_v17 }
 0x23c   : > { %995 = vst [vmem:[#allocation2 + $0x18] sm:$0xff] %v963_v23  ;;  %1011 = vst [vmem:[#allocation2 + $0x98] sm:$0xff] %v979_v24  ;;  %v2574_v25 = vpop.f32.mrb[8].mxu0  ;;  %v2622_v26 = vpop.f32.mrb[8].mxu1  ;;  %v457_v23 = vld [vmem:[#allocation2 + $0x50] sm:$0xff] }
 0x23d   : > { %v2575_v28 = vpop.f32.mrb[9].mxu0  ;;  %v2623_v30 = vpop.f32.mrb[9].mxu1 }
 0x23e   : > { %v2576_v31 = vadd.f32 %v2575_v28, %v2574_v25  ;;  %v2624_v32 = vadd.f32 %v2623_v30, %v2622_v26  ;;  %v2577_v33 = vpop.f32.mrb[10].mxu0  ;;  %v2625_v34 = vpop.f32.mrb[10].mxu1  ;;  %v473_v25 = vld [vmem:[#allocation2 + $0xd0] sm:$0xff] }
 0x23f   : > { %v2578_v36 = vpop.f32.mrb[11].mxu0  ;;  %v2626_v38 = vpop.f32.mrb[11].mxu1 }
 0x240   : > { %v964_v39 = vadd.f32 %v2576_v31, %v451_v27  ;;  %v980_v40 = vadd.f32 %v2624_v32, %v467_v29  ;;  %v2579_v41 = vadd.f32 %v2578_v36, %v2577_v33  ;;  %v2627_v42 = vadd.f32 %v2626_v38, %v2625_v34  ;;  %v458_v31 = vld [vmem:[#allocation2 + $0x58] sm:$0xff] }
 0x241   : > { %v474_v33 = vld [vmem:[#allocation2 + $0xd8] sm:$0xff] }
 0x242   : > { %996 = vst [vmem:[#allocation2 + $0x20] sm:$0xff] %v964_v39  ;;  %1012 = vst [vmem:[#allocation2 + $0xa0] sm:$0xff] %v980_v40  ;;  %v965_v43 = vadd.f32 %v2579_v41, %v452_v35  ;;  %v981_v44 = vadd.f32 %v2627_v42, %v468_v37 }
 0x244   : > { %997 = vst [vmem:[#allocation2 + $0x28] sm:$0xff] %v965_v43  ;;  %1013 = vst [vmem:[#allocation2 + $0xa8] sm:$0xff] %v981_v44  ;;  %v2580_v45 = vpop.f32.mrb[12].mxu0  ;;  %v2628_v46 = vpop.f32.mrb[12].mxu1  ;;  %v459_v43 = vld [vmem:[#allocation2 + $0x60] sm:$0xff] }
 0x245   : > { %v2581_v48 = vpop.f32.mrb[13].mxu0  ;;  %v2629_v50 = vpop.f32.mrb[13].mxu1 }
 0x246   : > { %v2582_v51 = vadd.f32 %v2581_v48, %v2580_v45  ;;  %v2630_v52 = vadd.f32 %v2629_v50, %v2628_v46  ;;  %v2583_v53 = vpop.f32.mrb[14].mxu0  ;;  %v2631_v54 = vpop.f32.mrb[14].mxu1  ;;  %v475_v45 = vld [vmem:[#allocation2 + $0xe0] sm:$0xff] }
 0x247   : > { %v2584_v56 = vpop.f32.mrb[15].mxu0  ;;  %v2632_v58 = vpop.f32.mrb[15].mxu1 }
 0x248   : > { %v966_v59 = vadd.f32 %v2582_v51, %v453_v47  ;;  %v982_v60 = vadd.f32 %v2630_v52, %v469_v49  ;;  %v2585_v61 = vadd.f32 %v2584_v56, %v2583_v53  ;;  %v2633_v62 = vadd.f32 %v2632_v58, %v2631_v54  ;;  %v460_v51 = vld [vmem:[#allocation2 + $0x68] sm:$0xff] }
 0x249   : > { %v476_v53 = vld [vmem:[#allocation2 + $0xe8] sm:$0xff] }
 0x24a   : > { %998 = vst [vmem:[#allocation2 + $0x30] sm:$0xff] %v966_v59  ;;  %1014 = vst [vmem:[#allocation2 + $0xb0] sm:$0xff] %v982_v60  ;;  %v967_v63 = vadd.f32 %v2585_v61, %v454_v55  ;;  %v983_v0 = vadd.f32 %v2633_v62, %v470_v57 }
 0x24c   : > { %999 = vst [vmem:[#allocation2 + $0x38] sm:$0xff] %v967_v63  ;;  %1015 = vst [vmem:[#allocation2 + $0xb8] sm:$0xff] %v983_v0  ;;  %v2586_v1 = vpop.f32.mrb[16].mxu0  ;;  %v2634_v2 = vpop.f32.mrb[16].mxu1  ;;  %v461_v63 = vld [vmem:[#allocation2 + $0x70] sm:$0xff] }
 0x24d   : > { %v2587_v4 = vpop.f32.mrb[17].mxu0  ;;  %v2635_v6 = vpop.f32.mrb[17].mxu1 }
 0x24e   : > { %v2588_v7 = vadd.f32 %v2587_v4, %v2586_v1  ;;  %v2636_v8 = vadd.f32 %v2635_v6, %v2634_v2  ;;  %v2589_v9 = vpop.f32.mrb[18].mxu0  ;;  %v2637_v10 = vpop.f32.mrb[18].mxu1  ;;  %v477_v1 = vld [vmem:[#allocation2 + $0xf0] sm:$0xff] }
 0x24f   : > { %v2590_v12 = vpop.f32.mrb[19].mxu0  ;;  %v2638_v14 = vpop.f32.mrb[19].mxu1 }
 0x250   : > { %v968_v15 = vadd.f32 %v2588_v7, %v455_v3  ;;  %v984_v16 = vadd.f32 %v2636_v8, %v471_v5  ;;  %v2591_v17 = vadd.f32 %v2590_v12, %v2589_v9  ;;  %v2639_v18 = vadd.f32 %v2638_v14, %v2637_v10  ;;  %v462_v7 = vld [vmem:[#allocation2 + $0x78] sm:$0xff] }
 0x251   : > { %v478_v9 = vld [vmem:[#allocation2 + $0xf8] sm:$0xff] }
 0x252   : > { %1000 = vst [vmem:[#allocation2 + $0x40] sm:$0xff] %v968_v15  ;;  %1016 = vst [vmem:[#allocation2 + $0xc0] sm:$0xff] %v984_v16  ;;  %v969_v19 = vadd.f32 %v2591_v17, %v456_v11  ;;  %v985_v20 = vadd.f32 %v2639_v18, %v472_v13 }
 0x254   : > { %1001 = vst [vmem:[#allocation2 + $0x48] sm:$0xff] %v969_v19  ;;  %1017 = vst [vmem:[#allocation2 + $0xc8] sm:$0xff] %v985_v20  ;;  %v2592_v21 = vpop.f32.mrb[20].mxu0  ;;  %v2640_v22 = vpop.f32.mrb[20].mxu1 }
 0x255   : > { %v2593_v24 = vpop.f32.mrb[21].mxu0  ;;  %v2641_v26 = vpop.f32.mrb[21].mxu1 }
 0x256   : > { %v2594_v27 = vadd.f32 %v2593_v24, %v2592_v21  ;;  %v2642_v28 = vadd.f32 %v2641_v26, %v2640_v22  ;;  %v2595_v29 = vpop.f32.mrb[22].mxu0  ;;  %v2643_v30 = vpop.f32.mrb[22].mxu1 }
 0x257   : > { %v2596_v32 = vpop.f32.mrb[23].mxu0  ;;  %v2644_v34 = vpop.f32.mrb[23].mxu1 }
 0x258   : > { %v970_v35 = vadd.f32 %v2594_v27, %v457_v23  ;;  %v986_v36 = vadd.f32 %v2642_v28, %v473_v25  ;;  %v2597_v37 = vadd.f32 %v2596_v32, %v2595_v29  ;;  %v2645_v38 = vadd.f32 %v2644_v34, %v2643_v30 }
 0x25a   : > { %1002 = vst [vmem:[#allocation2 + $0x50] sm:$0xff] %v970_v35  ;;  %1018 = vst [vmem:[#allocation2 + $0xd0] sm:$0xff] %v986_v36  ;;  %v971_v39 = vadd.f32 %v2597_v37, %v458_v31  ;;  %v987_v40 = vadd.f32 %v2645_v38, %v474_v33 }
 0x25c   : > { %1003 = vst [vmem:[#allocation2 + $0x58] sm:$0xff] %v971_v39  ;;  %1019 = vst [vmem:[#allocation2 + $0xd8] sm:$0xff] %v987_v40  ;;  %v2598_v41 = vpop.f32.mrb[24].mxu0  ;;  %v2646_v42 = vpop.f32.mrb[24].mxu1 }
 0x25d   : > { %v2599_v44 = vpop.f32.mrb[25].mxu0  ;;  %v2647_v46 = vpop.f32.mrb[25].mxu1 }
 0x25e   : > { %v2600_v47 = vadd.f32 %v2599_v44, %v2598_v41  ;;  %v2648_v48 = vadd.f32 %v2647_v46, %v2646_v42  ;;  %v2601_v49 = vpop.f32.mrb[26].mxu0  ;;  %v2649_v50 = vpop.f32.mrb[26].mxu1 }
 0x25f   : > { %v2602_v52 = vpop.f32.mrb[27].mxu0  ;;  %v2650_v54 = vpop.f32.mrb[27].mxu1 }
 0x260   : > { %v972_v55 = vadd.f32 %v2600_v47, %v459_v43  ;;  %v988_v56 = vadd.f32 %v2648_v48, %v475_v45  ;;  %v2603_v57 = vadd.f32 %v2602_v52, %v2601_v49  ;;  %v2651_v58 = vadd.f32 %v2650_v54, %v2649_v50 }
 0x262   : > { %1004 = vst [vmem:[#allocation2 + $0x60] sm:$0xff] %v972_v55  ;;  %1020 = vst [vmem:[#allocation2 + $0xe0] sm:$0xff] %v988_v56  ;;  %v973_v59 = vadd.f32 %v2603_v57, %v460_v51  ;;  %v989_v60 = vadd.f32 %v2651_v58, %v476_v53 }
 0x264   : > { %1005 = vst [vmem:[#allocation2 + $0x68] sm:$0xff] %v973_v59  ;;  %1021 = vst [vmem:[#allocation2 + $0xe8] sm:$0xff] %v989_v60  ;;  %v2604_v61 = vpop.f32.mrb[28].mxu0  ;;  %v2652_v62 = vpop.f32.mrb[28].mxu1 }
 0x265   : > { %v2605_v0 = vpop.f32.mrb[29].mxu0  ;;  %v2653_v2 = vpop.f32.mrb[29].mxu1 }
 0x266   : > { %v2606_v3 = vadd.f32 %v2605_v0, %v2604_v61  ;;  %v2654_v4 = vadd.f32 %v2653_v2, %v2652_v62  ;;  %v2607_v5 = vpop.f32.mrb[30].mxu0  ;;  %v2655_v6 = vpop.f32.mrb[30].mxu1 }
 0x267   : > { %v2608_v8 = vpop.f32.mrb[31].mxu0  ;;  %v2656_v10 = vpop.f32.mrb[31].mxu1 }
 0x268   : > { %v974_v11 = vadd.f32 %v2606_v3, %v461_v63  ;;  %v990_v12 = vadd.f32 %v2654_v4, %v477_v1  ;;  %v2609_v13 = vadd.f32 %v2608_v8, %v2607_v5  ;;  %v2657_v14 = vadd.f32 %v2656_v10, %v2655_v6 }
 0x26a   : > { %1006 = vst [vmem:[#allocation2 + $0x70] sm:$0xff] %v974_v11  ;;  %1022 = vst [vmem:[#allocation2 + $0xf0] sm:$0xff] %v990_v12  ;;  %v975_v15 = vadd.f32 %v2609_v13, %v462_v7  ;;  %v991_v16 = vadd.f32 %v2657_v14, %v478_v9 }
 0x26c   : > { %1007 = vst [vmem:[#allocation2 + $0x78] sm:$0xff] %v975_v15  ;;  %1023 = vst [vmem:[#allocation2 + $0xf8] sm:$0xff] %v991_v16 }
 0x26d PF: > { %s4464_s6 = sld [smem:[#allocation30_spill]] }
 0x273   : > { %p2313_p11 = scmp.ne.s32.totalorder %s4464_s6, 1 }
 0x274   : > { %v3089_v17 = vld [vmem:[#allocation14] sm:$0xff] (!%p2313_p11)   ;;  %v3091_v19 = vld [vmem:[#allocation14 + $0x8] sm:$0xff] (!%p2313_p11)   ;;  %v3093_v21 = vld [vmem:[#allocation14 + $0x10] sm:$0xff] (!%p2313_p11)  }
 0x275   : > { %1027 = sbr.rel (%p2313_p11) target bundleno = 973 (0x3cd), region = 72  ;;  %v3090_v18 = vld [vmem:[#allocation12] sm:$0xff] (!%p2313_p11)   ;;  %2706 = vmatprep.subr.bf16.mxu1 (!%p2313_p11), %v3089_v17  ;;  %v3092_v20 = vld [vmem:[#allocation12 + $0x8] sm:$0xff] (!%p2313_p11)   ;;  %v3094_v22 = vld [vmem:[#allocation12 + $0x10] sm:$0xff] (!%p2313_p11)  }
 0x276   : > { %2754 = vmatprep.subr.bf16.mxu0 (!%p2313_p11), %v3090_v18  ;;  %2707 = vmatpush3.bf16.msra.mxu1 (!%p2313_p11), %v3089_v17  ;;  %v3095_v23 = vld [vmem:[#allocation14 + $0x18] sm:$0xff] (!%p2313_p11)   ;;  %v3097_v25 = vld [vmem:[#allocation14 + $0x20] sm:$0xff] (!%p2313_p11)   ;;  %v3099_v27 = vld [vmem:[#allocation14 + $0x28] sm:$0xff] (!%p2313_p11)  }
 0x277   : > { %2755 = vmatpush3.bf16.msra.mxu0 (!%p2313_p11), %v3090_v18  ;;  %2708 = vmatprep.subr.bf16.mxu1 (!%p2313_p11), %v3091_v19  ;;  %v3096_v24 = vld [vmem:[#allocation12 + $0x18] sm:$0xff] (!%p2313_p11)   ;;  %v3098_v26 = vld [vmem:[#allocation12 + $0x20] sm:$0xff] (!%p2313_p11)   ;;  %v3100_v28 = vld [vmem:[#allocation12 + $0x28] sm:$0xff] (!%p2313_p11)  }
 0x278   : > { %2756 = vmatprep.subr.bf16.mxu0 (!%p2313_p11), %v3092_v20  ;;  %v3105_v29 = vld [vmem:[%s4042_s5] sm:$0xff] (!%p2313_p11)   ;;  %v1029_v31 = vld [vmem:[#allocation2 + $0x8] sm:$0xff] (!%p2313_p11)  ;;  %v3101_v33 = vld [vmem:[#allocation14 + $0x30] sm:$0xff] (!%p2313_p11)  }
 0x279   : > { %v1028_v30 = vld [vmem:[#allocation2] sm:$0xff] (!%p2313_p11)  ;;  %2722 = vmatprep.mubr.bf16.mxu1 (!%p2313_p11), %v3105_v29  ;;  %v3102_v34 = vld [vmem:[#allocation12 + $0x30] sm:$0xff] (!%p2313_p11)   ;;  %v3103_v35 = vld [vmem:[#allocation14 + $0x38] sm:$0xff] (!%p2313_p11)  }
 0x27a   : > { %2709 = vmatpush3.bf16.msra.mxu1 (!%p2313_p11), %v3091_v19  ;;  %v1060_v32 = vpack.c.bf16 (!%p2313_p11), %v1029_v31, %v1028_v30  ;;  %v3104_v36 = vld [vmem:[#allocation12 + $0x38] sm:$0xff] (!%p2313_p11)   ;;  %v1030_v37 = vld [vmem:[#allocation2 + $0x10] sm:$0xff] (!%p2313_p11)  ;;  %v1032_v39 = vld [vmem:[#allocation2 + $0x20] sm:$0xff] (!%p2313_p11) }
 0x27b   : > { %2757 = vmatpush3.bf16.msra.mxu0 (!%p2313_p11), %v3092_v20  ;;  %2710 = vmatprep.subr.bf16.mxu1 (!%p2313_p11), %v3093_v21  ;;  %v1031_v38 = vld [vmem:[#allocation2 + $0x18] sm:$0xff] (!%p2313_p11)  ;;  %v1033_v40 = vld [vmem:[#allocation2 + $0x28] sm:$0xff] (!%p2313_p11)  ;;  %v3107_v43 = vld [vmem:[%s4042_s5 + $0x10] sm:$0xff] (!%p2313_p11)  }
 0x27c   : > { %2758 = vmatprep.subr.bf16.mxu0 %v3094_v22  ;;  %2770 = vmatprep.mubr.bf16.mxu0 %v1060_v32  ;;  %v3106_v41 = vld [vmem:[%s4042_s5 + $0x8] sm:$0xff]   ;;  %v1061_v42 = vpack.c.bf16 %v1031_v38, %v1030_v37  ;;  %v1062_v44 = vpack.c.bf16 %v1033_v40, %v1032_v39  ;;  %v1034_v45 = vld [vmem:[#allocation2 + $0x30] sm:$0xff]  ;;  %v1035_v46 = vld [vmem:[#allocation2 + $0x38] sm:$0xff] }
 0x27d   : > { %v1036_v47 = vld [vmem:[#allocation2 + $0x40] sm:$0xff]  ;;  %v1037_v48 = vld [vmem:[#allocation2 + $0x48] sm:$0xff]  ;;  %v3108_v49 = vld [vmem:[%s4042_s5 + $0x18] sm:$0xff]   ;;  %v1063_v50 = vpack.c.bf16 %v1035_v46, %v1034_v45 }
 0x27e   : > { %2711 = vmatpush3.bf16.msra.mxu1 %v3093_v21  ;;  %v3109_v51 = vld [vmem:[%s4042_s5 + $0x20] sm:$0xff]   ;;  %v1064_v52 = vpack.c.bf16 %v1037_v48, %v1036_v47  ;;  %v1038_v53 = vld [vmem:[#allocation2 + $0x50] sm:$0xff]  ;;  %v1039_v54 = vld [vmem:[#allocation2 + $0x58] sm:$0xff] }
 0x27f   : > { %2759 = vmatpush3.bf16.msra.mxu0 %v3094_v22  ;;  %2712 = vmatprep.subr.bf16.mxu1 %v3095_v23  ;;  %v1040_v55 = vld [vmem:[#allocation2 + $0x60] sm:$0xff]  ;;  %v1041_v56 = vld [vmem:[#allocation2 + $0x68] sm:$0xff]  ;;  %v1065_v58 = vpack.c.bf16 %v1039_v54, %v1038_v53  ;;  %v3111_v59 = vld [vmem:[%s4042_s5 + $0x30] sm:$0xff]  }
 0x280   : > { %2760 = vmatprep.subr.bf16.mxu0 %v3096_v24  ;;  %v3110_v57 = vld [vmem:[%s4042_s5 + $0x28] sm:$0xff]   ;;  %v1066_v60 = vpack.c.bf16 %v1041_v56, %v1040_v55  ;;  %v1042_v61 = vld [vmem:[#allocation2 + $0x70] sm:$0xff]  ;;  %v1043_v62 = vld [vmem:[#allocation2 + $0x78] sm:$0xff] }
 0x281   : > { %v1044_v63 = vld [vmem:[#allocation2 + $0x80] sm:$0xff]  ;;  %v1045_v0 = vld [vmem:[#allocation2 + $0x88] sm:$0xff]  ;;  %v3112_v1 = vld [vmem:[%s4042_s5 + $0x38] sm:$0xff]   ;;  %v1067_v2 = vpack.c.bf16 %v1043_v62, %v1042_v61 }
 0x282   : > { %2713 = vmatpush3.bf16.msra.mxu1 %v3095_v23  ;;  %v3113_v3 = vld [vmem:[%s4042_s5 + $0x40] sm:$0xff]   ;;  %v1068_v4 = vpack.c.bf16 %v1045_v0, %v1044_v63  ;;  %v1046_v5 = vld [vmem:[#allocation2 + $0x90] sm:$0xff]  ;;  %v1047_v6 = vld [vmem:[#allocation2 + $0x98] sm:$0xff] }
 0x283   : > { %2761 = vmatpush3.bf16.msra.mxu0 %v3096_v24  ;;  %2714 = vmatprep.subr.bf16.mxu1 %v3097_v25  ;;  %v1048_v7 = vld [vmem:[#allocation2 + $0xa0] sm:$0xff]  ;;  %v1049_v8 = vld [vmem:[#allocation2 + $0xa8] sm:$0xff]  ;;  %v1069_v10 = vpack.c.bf16 %v1047_v6, %v1046_v5  ;;  %v3115_v11 = vld [vmem:[%s4042_s5 + $0x50] sm:$0xff]  }
 0x284   : > { %2762 = vmatprep.subr.bf16.mxu0 %v3098_v26  ;;  %v3114_v9 = vld [vmem:[%s4042_s5 + $0x48] sm:$0xff]   ;;  %v1070_v12 = vpack.c.bf16 %v1049_v8, %v1048_v7  ;;  %v1050_v13 = vld [vmem:[#allocation2 + $0xb0] sm:$0xff]  ;;  %v1051_v14 = vld [vmem:[#allocation2 + $0xb8] sm:$0xff] }
 0x285   : > { %v1052_v15 = vld [vmem:[#allocation2 + $0xc0] sm:$0xff]  ;;  %v1053_v16 = vld [vmem:[#allocation2 + $0xc8] sm:$0xff]  ;;  %v3116_v17 = vld [vmem:[%s4042_s5 + $0x58] sm:$0xff]   ;;  %v1071_v18 = vpack.c.bf16 %v1051_v14, %v1050_v13 }
 0x286   : > { %2715 = vmatpush3.bf16.msra.mxu1 %v3097_v25  ;;  %v3117_v19 = vld [vmem:[%s4042_s5 + $0x60] sm:$0xff]   ;;  %v1072_v20 = vpack.c.bf16 %v1053_v16, %v1052_v15  ;;  %v1054_v21 = vld [vmem:[#allocation2 + $0xd0] sm:$0xff]  ;;  %v1055_v22 = vld [vmem:[#allocation2 + $0xd8] sm:$0xff] }
 0x287   : > { %2763 = vmatpush3.bf16.msra.mxu0 %v3098_v26  ;;  %2716 = vmatprep.subr.bf16.mxu1 %v3099_v27  ;;  %v1056_v23 = vld [vmem:[#allocation2 + $0xe0] sm:$0xff]  ;;  %v1057_v24 = vld [vmem:[#allocation2 + $0xe8] sm:$0xff]  ;;  %v1073_v26 = vpack.c.bf16 %v1055_v22, %v1054_v21  ;;  %v1058_v29 = vld [vmem:[#allocation2 + $0xf0] sm:$0xff] }
 0x288   : > { %2764 = vmatprep.subr.bf16.mxu0 %v3100_v28  ;;  %v3118_v25 = vld [vmem:[%s4042_s5 + $0x68] sm:$0xff]   ;;  %v1059_v30 = vld [vmem:[#allocation2 + $0xf8] sm:$0xff] }
 0x289   : > { %v3120_v31 = vld [vmem:[%s4042_s5 + $0x78] sm:$0xff]   ;;  %v1075_v32 = vpack.c.bf16 %v1059_v30, %v1058_v29 }
 0x28a   : > { %2717 = vmatpush3.bf16.msra.mxu1 %v3099_v27  ;;  %v3119_v27 = vld [vmem:[%s4042_s5 + $0x70] sm:$0xff]  }
 0x28b   : > { %2765 = vmatpush3.bf16.msra.mxu0 %v3100_v28  ;;  %2718 = vmatprep.subr.bf16.mxu1 %v3101_v33  ;;  %v1074_v28 = vpack.c.bf16 %v1057_v24, %v1056_v23 }
 0x28c   : > { %2766 = vmatprep.subr.bf16.mxu0 %v3102_v34 }
 0x28e   : > { %2719 = vmatpush3.bf16.msra.mxu1 %v3101_v33 }
 0x28f   : > { %2767 = vmatpush3.bf16.msra.mxu0 %v3102_v34  ;;  %2720 = vmatprep.subr.bf16.mxu1 %v3103_v35 }
 0x290   : > { %2768 = vmatprep.subr.bf16.mxu0 %v3104_v36 }
 0x292   : > { %2721 = vmatpush3.bf16.msra.mxu1 %v3103_v35 }
 0x293   : > { %2769 = vmatpush3.bf16.msra.mxu0 %v3104_v36 }
 0x295   : > { %2723 = vmatmul.mubr.bf16.vlgmr.msra.gmra.mrb[0].mxu1 %v3106_v41 }
 0x296   : > { %2771 = vmatmul.mubr.bf16.vlgmr.msra.gmra.mrb[0].mxu0 %v1061_v42  ;;  %2726 = vmatprep.mubr.bf16.mxu1 %v3107_v43 }
 0x297   : > { %2774 = vmatprep.mubr.bf16.mxu0 %v1062_v44 }
 0x29d   : > { %2727 = vmatmul.mubr.bf16.gmra.mrb[4].mxu1 %v3108_v49 }
 0x29e   : > { %2775 = vmatmul.mubr.bf16.gmra.mrb[4].mxu0 %v1063_v50  ;;  %2730 = vmatprep.mubr.bf16.mxu1 %v3109_v51 }
 0x29f   : > { %2778 = vmatprep.mubr.bf16.mxu0 %v1064_v52 }
 0x2a5   : > { %2731 = vmatmul.mubr.bf16.gmra.mrb[8].mxu1 %v3110_v57 }
 0x2a6   : > { %2779 = vmatmul.mubr.bf16.gmra.mrb[8].mxu0 %v1065_v58  ;;  %2734 = vmatprep.mubr.bf16.mxu1 %v3111_v59 }
 0x2a7   : > { %2782 = vmatprep.mubr.bf16.mxu0 %v1066_v60 }
 0x2ad   : > { %2735 = vmatmul.mubr.bf16.gmra.mrb[12].mxu1 %v3112_v1 }
 0x2ae   : > { %2783 = vmatmul.mubr.bf16.gmra.mrb[12].mxu0 %v1067_v2  ;;  %2738 = vmatprep.mubr.bf16.mxu1 %v3113_v3 }
 0x2af   : > { %2786 = vmatprep.mubr.bf16.mxu0 %v1068_v4 }
 0x2b5   : > { %2739 = vmatmul.mubr.bf16.gmra.mrb[16].mxu1 %v3114_v9 }
 0x2b6   : > { %2787 = vmatmul.mubr.bf16.gmra.mrb[16].mxu0 %v1069_v10  ;;  %2742 = vmatprep.mubr.bf16.mxu1 %v3115_v11 }
 0x2b7   : > { %2790 = vmatprep.mubr.bf16.mxu0 %v1070_v12 }
 0x2bd   : > { %2743 = vmatmul.mubr.bf16.gmra.mrb[20].mxu1 %v3116_v17 }
 0x2be   : > { %2791 = vmatmul.mubr.bf16.gmra.mrb[20].mxu0 %v1071_v18  ;;  %2746 = vmatprep.mubr.bf16.mxu1 %v3117_v19 }
 0x2bf   : > { %2794 = vmatprep.mubr.bf16.mxu0 %v1072_v20 }
 0x2c5   : > { %2747 = vmatmul.mubr.bf16.gmra.mrb[24].mxu1 %v3118_v25 }
 0x2c6   : > { %2795 = vmatmul.mubr.bf16.gmra.mrb[24].mxu0 %v1073_v26  ;;  %2750 = vmatprep.mubr.bf16.mxu1 %v3119_v27 }
 0x2c7   : > { %2798 = vmatprep.mubr.bf16.mxu0 %v1074_v28 }
 0x2cd   : > { %2751 = vmatmul.mubr.bf16.gmra.mrb[28].mxu1 %v3120_v31 }
 0x2ce   : > { %2799 = vmatmul.mubr.bf16.gmra.mrb[28].mxu0 %v1075_v32 }
 0x368   : > { %v2724_v33 = vpop.f32.mrb[0].mxu1 }
 0x369   : > { %v2772_v34 = vpop.f32.mrb[0].mxu0  ;;  %v1318_v35 = vpop.f32.mrb[1].mxu1 }
 0x36a   : > { %v4129_v36 = vadd.f32 %v2772_v34, %v2724_v33  ;;  %v1527_v37 = vpop.f32.mrb[1].mxu0  ;;  %v2725_v38 = vpop.f32.mrb[2].mxu1 }
 0x36b   : > { %v4131_v39 = vadd.f32 %v1527_v37, %v1318_v35  ;;  %v2773_v40 = vpop.f32.mrb[2].mxu0  ;;  %v1321_v41 = vpop.f32.mrb[3].mxu1 }
 0x36c   : > { %v2348_v42 = vmul.f32 -1.442695, %v4129_v36  ;;  %v4134_v43 = vadd.f32 %v2773_v40, %v2725_v38  ;;  %v1530_v44 = vpop.f32.mrb[3].mxu0 }
 0x36d   : > { %v2346_v45 = vmul.f32 -1.442695, %v4131_v39  ;;  %v4137_v46 = vadd.f32 %v1530_v44, %v1321_v41 }
 0x36e   : > { %3121 = vpow2.f32 %v2348_v42  ;;  %v2349_v47 = vmul.f32 -1.442695, %v4134_v43 }
 0x36f   : > { %3123 = vpow2.f32 %v2346_v45  ;;  %v2347_v48 = vmul.f32 -1.442695, %v4137_v46 }
 0x370   : > { %3125 = vpow2.f32 %v2349_v47  ;;  %v2728_v49 = vpop.f32.mrb[4].mxu1 }
 0x371   : > { %3127 = vpow2.f32 %v2347_v48  ;;  %v2776_v50 = vpop.f32.mrb[4].mxu0  ;;  %v1334_v51 = vpop.f32.mrb[5].mxu1 }
 0x372   : > { %v4141_v52 = vadd.f32 %v2776_v50, %v2728_v49  ;;  %v1543_v53 = vpop.f32.mrb[5].mxu0  ;;  %v2729_v54 = vpop.f32.mrb[6].mxu1 }
 0x373   : > { %v4143_v55 = vadd.f32 %v1543_v53, %v1334_v51  ;;  %v2777_v56 = vpop.f32.mrb[6].mxu0  ;;  %v1337_v57 = vpop.f32.mrb[7].mxu1 }
 0x374   : > { %v2352_v58 = vmul.f32 -1.442695, %v4141_v52  ;;  %v4146_v59 = vadd.f32 %v2777_v56, %v2729_v54  ;;  %v1546_v60 = vpop.f32.mrb[7].mxu0 }
 0x375   : > { %v2350_v61 = vmul.f32 -1.442695, %v4143_v55  ;;  %v4149_v62 = vadd.f32 %v1546_v60, %v1337_v57 }
 0x376   : > { %3129 = vpow2.f32 %v2352_v58  ;;  %v2353_v63 = vmul.f32 -1.442695, %v4146_v59 }
 0x377   : > { %3131 = vpow2.f32 %v2350_v61  ;;  %v2351_v0 = vmul.f32 -1.442695, %v4149_v62 }
 0x378   : > { %v3122_v1 = vpop.eup %3121  ;;  %3133 = vpow2.f32 %v2353_v63  ;;  %v2732_v2 = vpop.f32.mrb[8].mxu1 }
 0x379   : > { %v3124_v3 = vpop.eup %3123  ;;  %v1752_v4 = vadd.f32 1.0, %v3122_v1  ;;  %3135 = vpow2.f32 %v2351_v0  ;;  %v2780_v5 = vpop.f32.mrb[8].mxu0 }
 0x37a   : > { %v1350_v6 = vpop.f32.mrb[9].mxu1  ;;  %v3126_v7 = vpop.eup %3125  ;;  %v1750_v8 = vadd.f32 1.0, %v3124_v3  ;;  %v4153_v9 = vadd.f32 %v2780_v5, %v2732_v2 }
 0x37b   : > { %v1559_v10 = vpop.f32.mrb[9].mxu0  ;;  %v2733_v11 = vpop.f32.mrb[10].mxu1  ;;  %3137 = vrcp.f32 %v1752_v4  ;;  %v1753_v13 = vadd.f32 1.0, %v3126_v7 }
 0x37c   : > { %v3128_v12 = vpop.eup %3127  ;;  %v4155_v14 = vadd.f32 %v1559_v10, %v1350_v6  ;;  %v2781_v15 = vpop.f32.mrb[10].mxu0  ;;  %3139 = vrcp.f32 %v1750_v8  ;;  %v2356_v18 = vmul.f32 -1.442695, %v4153_v9 }
 0x37d   : > { %v1353_v16 = vpop.f32.mrb[11].mxu1  ;;  %v1751_v17 = vadd.f32 1.0, %v3128_v12  ;;  %v4158_v19 = vadd.f32 %v2781_v15, %v2733_v11  ;;  %v1562_v20 = vpop.f32.mrb[11].mxu0  ;;  %3141 = vrcp.f32 %v1753_v13 }
 0x37e   : > { %v2354_v21 = vmul.f32 -1.442695, %v4155_v14  ;;  %v4161_v22 = vadd.f32 %v1562_v20, %v1353_v16 }
 0x37f   : > { %3143 = vrcp.f32 %v1751_v17  ;;  %v2357_v23 = vmul.f32 -1.442695, %v4158_v19 }
 0x380   : > { %3145 = vpow2.f32 %v2356_v18  ;;  %v2355_v24 = vmul.f32 -1.442695, %v4161_v22  ;;  %v3130_v25 = vpop.eup %3129  ;;  %v2736_v26 = vpop.f32.mrb[12].mxu1 }
 0x381   : > { %3147 = vpow2.f32 %v2354_v21  ;;  %v3132_v27 = vpop.eup %3131  ;;  %v1756_v28 = vadd.f32 1.0, %v3130_v25  ;;  %v2784_v29 = vpop.f32.mrb[12].mxu0 }
 0x382   : > { %3149 = vpow2.f32 %v2357_v23  ;;  %v1366_v30 = vpop.f32.mrb[13].mxu1  ;;  %v3134_v31 = vpop.eup %3133  ;;  %v1754_v32 = vadd.f32 1.0, %v3132_v27  ;;  %v4165_v33 = vadd.f32 %v2784_v29, %v2736_v26 }
 0x383   : > { %3151 = vpow2.f32 %v2355_v24  ;;  %v1575_v34 = vpop.f32.mrb[13].mxu0  ;;  %v2737_v35 = vpop.f32.mrb[14].mxu1  ;;  %v1757_v38 = vadd.f32 1.0, %v3134_v31 }
 0x384   : > { %v3136_v37 = vpop.eup %3135  ;;  %3153 = vrcp.f32 %v1756_v28  ;;  %v4167_v40 = vadd.f32 %v1575_v34, %v1366_v30  ;;  %v2785_v41 = vpop.f32.mrb[14].mxu0  ;;  %v2360_v45 = vmul.f32 -1.442695, %v4165_v33 }
 0x385   : > { %v1369_v42 = vpop.f32.mrb[15].mxu1  ;;  %3155 = vrcp.f32 %v1754_v32  ;;  %v1755_v44 = vadd.f32 1.0, %v3136_v37  ;;  %v4170_v47 = vadd.f32 %v2785_v41, %v2737_v35  ;;  %v1578_v48 = vpop.f32.mrb[15].mxu0 }
 0x386   : > { %v3138_v49 = vpop.eup %3137  ;;  %3157 = vrcp.f32 %v1757_v38  ;;  %v2358_v50 = vmul.f32 -1.442695, %v4167_v40  ;;  %v4173_v51 = vadd.f32 %v1578_v48, %v1369_v42 }
 0x387   : > { %v3140_v53 = vpop.eup %3139  ;;  %v1848_v54 = vmul.f32 %v3138_v49, %v4129_v36  ;;  %3159 = vrcp.f32 %v1755_v44  ;;  %v2361_v56 = vmul.f32 -1.442695, %v4170_v47 }
 0x388   : > { %v3142_v57 = vpop.eup %3141  ;;  %v1846_v58 = vmul.f32 %v3140_v53, %v4131_v39  ;;  %3161 = vpow2.f32 %v2360_v45  ;;  %v2359_v60 = vmul.f32 -1.442695, %v4173_v51  ;;  %v2740_v0 = vpop.f32.mrb[16].mxu1 }
 0x389   : > { %v3144_v61 = vpop.eup %3143  ;;  %v1849_v63 = vmul.f32 %v3142_v57, %v4134_v43  ;;  %3163 = vpow2.f32 %v2358_v50  ;;  %v1880_v2 = vmul.f32 1.6778524, %v1848_v54  ;;  %v2788_v36 = vpop.f32.mrb[16].mxu0 }
 0x38a   : > { %v3146_v1 = vpop.eup %3145  ;;  %v1878_v3 = vmul.f32 1.6778524, %v1846_v58  ;;  %v1847_v4 = vmul.f32 %v3144_v61, %v4137_v46  ;;  %3165 = vpow2.f32 %v2361_v56  ;;  %v1382_v5 = vpop.f32.mrb[17].mxu1  ;;  %v4181_v39 = vadd.f32 %v2788_v36, %v2740_v0 }
 0x38b   : > { %v3148_v6 = vpop.eup %3147  ;;  %v1881_v7 = vmul.f32 1.6778524, %v1849_v63  ;;  %v1760_v8 = vadd.f32 1.0, %v3146_v1  ;;  %3167 = vpow2.f32 %v2359_v60  ;;  %v1591_v10 = vpop.f32.mrb[17].mxu0 }
 0x38c   : > { %v2741_v11 = vpop.f32.mrb[18].mxu1  ;;  %v3150_v12 = vpop.eup %3149  ;;  %v1879_v43 = vmul.f32 1.6778524, %v1847_v4  ;;  %v1758_v13 = vadd.f32 1.0, %v3148_v6  ;;  %v4183_v15 = vadd.f32 %v1591_v10, %v1382_v5  ;;  %v2364_v21 = vmul.f32 -1.442695, %v4181_v39 }
 0x38d   : > { %v2789_v16 = vpop.f32.mrb[18].mxu0  ;;  %v1385_v17 = vpop.f32.mrb[19].mxu1  ;;  %v2459_v18 = vpack.c.bf16 %v1881_v7, %v1880_v2  ;;  %3169 = vrcp.f32 %v1760_v8  ;;  %v1761_v20 = vadd.f32 1.0, %v3150_v12 }
 0x38e   : > { %v3152_v46 = vpop.eup %3151  ;;  %v1594_v23 = vpop.f32.mrb[19].mxu0  ;;  %v2454_v25 = vpack.c.bf16 %v1879_v43, %v1878_v3  ;;  %3171 = vrcp.f32 %v1758_v13  ;;  %v2362_v27 = vmul.f32 -1.442695, %v4183_v15  ;;  %v4189_v30 = vadd.f32 %v2789_v16, %v2741_v11 }
 0x38f   : > { %v3154_v24 = vpop.eup %3153  ;;  %v1759_v26 = vadd.f32 1.0, %v3152_v46  ;;  %2531 = vst [vmem:[%s4059_s11 + $0x8] sm:$0xff] %v2459_v18   ;;  %3173 = vrcp.f32 %v1761_v20  ;;  %v4191_v31 = vadd.f32 %v1594_v23, %v1385_v17 }
 0x390   : > { %v3156_v28 = vpop.eup %3155  ;;  %v1852_v29 = vmul.f32 %v3154_v24, %v4141_v52  ;;  %2455 = vst [vmem:[%s4059_s11] sm:$0xff] %v2454_v25   ;;  %v2365_v41 = vmul.f32 -1.442695, %v4189_v30  ;;  %v2744_v42 = vpop.f32.mrb[20].mxu1 }
 0x391   : > { %v3158_v32 = vpop.eup %3157  ;;  %v1850_v34 = vmul.f32 %v3156_v28, %v4143_v55  ;;  %3175 = vrcp.f32 %v1759_v26  ;;  %v2363_v48 = vmul.f32 -1.442695, %v4191_v31  ;;  %v2792_v49 = vpop.f32.mrb[20].mxu0 }
 0x392   : > { %v3160_v35 = vpop.eup %3159  ;;  %v1884_v37 = vmul.f32 1.6778524, %v1852_v29  ;;  %v1853_v38 = vmul.f32 %v3158_v32, %v4146_v59  ;;  %3177 = vpow2.f32 %v2364_v21  ;;  %v1398_v50 = vpop.f32.mrb[21].mxu1  ;;  %v4199_v56 = vadd.f32 %v2792_v49, %v2744_v42 }
 0x393   : > { %v3162_v44 = vpop.eup %3161  ;;  %v1882_v52 = vmul.f32 1.6778524, %v1850_v34  ;;  %v1851_v45 = vmul.f32 %v3160_v35, %v4149_v62  ;;  %3179 = vpow2.f32 %v2362_v27  ;;  %v1607_v59 = vpop.f32.mrb[21].mxu0 }
 0x394   : > { %v3164_v53 = vpop.eup %3163  ;;  %v1885_v55 = vmul.f32 1.6778524, %v1853_v38  ;;  %v1764_v54 = vadd.f32 1.0, %v3162_v44  ;;  %3181 = vpow2.f32 %v2365_v41  ;;  %v2745_v57 = vpop.f32.mrb[22].mxu1  ;;  %v4201_v63 = vadd.f32 %v1607_v59, %v1398_v50 }
 0x395   : > { %v3166_v58 = vpop.eup %3165  ;;  %v1883_v60 = vmul.f32 1.6778524, %v1851_v45  ;;  %v1762_v61 = vadd.f32 1.0, %v3164_v53  ;;  %3183 = vpow2.f32 %v2363_v48  ;;  %v2793_v62 = vpop.f32.mrb[22].mxu0  ;;  %v2368_v4 = vmul.f32 -1.442695, %v4199_v56 }
 0x396   : > { %v1401_v0 = vpop.f32.mrb[23].mxu1  ;;  %v3168_v1 = vpop.eup %3167  ;;  %v2469_v2 = vpack.c.bf16 %v1885_v55, %v1884_v37  ;;  %3185 = vrcp.f32 %v1764_v54  ;;  %v1765_v3 = vadd.f32 1.0, %v3166_v58  ;;  %v2366_v7 = vmul.f32 -1.442695, %v4201_v63 }
 0x397   : > { %v1610_v36 = vpop.f32.mrb[23].mxu0  ;;  %v2464_v5 = vpack.c.bf16 %v1883_v60, %v1882_v52  ;;  %3187 = vrcp.f32 %v1762_v61  ;;  %v1763_v6 = vadd.f32 1.0, %v3168_v1  ;;  %v3170_v8 = vpop.eup %3169  ;;  %v4206_v10 = vadd.f32 %v2793_v62, %v2745_v57 }
 0x398   : > { %2533 = vst [vmem:[%s4059_s11 + $0x18] sm:$0xff] %v2469_v2   ;;  %3189 = vrcp.f32 %v1765_v3  ;;  %v4208_v11 = vadd.f32 %v1610_v36, %v1401_v0  ;;  %v3172_v12 = vpop.eup %3171  ;;  %v1856_v43 = vmul.f32 %v3170_v8, %v4153_v9  ;;  %v2748_v18 = vpop.f32.mrb[24].mxu1 }
 0x399   : > { %2532 = vst [vmem:[%s4059_s11 + $0x10] sm:$0xff] %v2464_v5   ;;  %3191 = vrcp.f32 %v1763_v6  ;;  %v3174_v13 = vpop.eup %3173  ;;  %v1854_v16 = vmul.f32 %v3172_v12, %v4155_v14  ;;  %v2369_v17 = vmul.f32 -1.442695, %v4206_v10  ;;  %v2796_v23 = vpop.f32.mrb[24].mxu0 }
 0x39a   : > { %3193 = vpow2.f32 %v2368_v4  ;;  %v2367_v46 = vmul.f32 -1.442695, %v4208_v11  ;;  %v1857_v21 = vmul.f32 %v3174_v13, %v4158_v19  ;;  %v1414_v24 = vpop.f32.mrb[25].mxu1  ;;  %v1888_v26 = vmul.f32 1.6778524, %v1856_v43  ;;  %v1623_v14 = vpop.f32.mrb[25].mxu0 }
 0x39b   : > { %v3176_v20 = vpop.eup %3175  ;;  %3195 = vpow2.f32 %v2366_v7  ;;  %v4217_v27 = vadd.f32 %v2796_v23, %v2748_v18  ;;  %v2749_v28 = vpop.f32.mrb[26].mxu1  ;;  %v4219_v35 = vadd.f32 %v1623_v14, %v1414_v24  ;;  %v1886_v41 = vmul.f32 1.6778524, %v1854_v16 }
 0x39c   : > { %v3178_v25 = vpop.eup %3177  ;;  %v1855_v9 = vmul.f32 %v3176_v20, %v4161_v22  ;;  %3197 = vpow2.f32 %v2369_v17  ;;  %v1889_v32 = vmul.f32 1.6778524, %v1857_v21  ;;  %v2797_v37 = vpop.f32.mrb[26].mxu0 }
 0x39d   : > { %v3180_v29 = vpop.eup %3179  ;;  %v1768_v34 = vadd.f32 1.0, %v3178_v25  ;;  %3199 = vpow2.f32 %v2367_v46  ;;  %v1417_v19 = vpop.f32.mrb[27].mxu1  ;;  %v4221_v52 = vadd.f32 %v2797_v37, %v2749_v28  ;;  %v2372_v50 = vmul.f32 -1.442695, %v4217_v27 }
 0x39e   : > { %v3182_v38 = vpop.eup %3181  ;;  %v1887_v42 = vmul.f32 1.6778524, %v1855_v9  ;;  %v1766_v44 = vadd.f32 1.0, %v3180_v29  ;;  %v1626_v22 = vpop.f32.mrb[27].mxu0  ;;  %v2479_v48 = vpack.c.bf16 %v1889_v32, %v1888_v26  ;;  %v2370_v59 = vmul.f32 -1.442695, %v4219_v35 }
 0x39f   : > { %v3184_v45 = vpop.eup %3183  ;;  %3201 = vrcp.f32 %v1768_v34  ;;  %v1769_v49 = vadd.f32 1.0, %v3182_v38  ;;  %v2373_v60 = vmul.f32 -1.442695, %v4221_v52  ;;  %v4228_v61 = vadd.f32 %v1626_v22, %v1417_v19 }
 0x3a0   : > { %v3186_v53 = vpop.eup %3185  ;;  %v2474_v55 = vpack.c.bf16 %v1887_v42, %v1886_v41  ;;  %3203 = vrcp.f32 %v1766_v44  ;;  %v1767_v54 = vadd.f32 1.0, %v3184_v45  ;;  %2535 = vst [vmem:[%s4059_s11 + $0x28] sm:$0xff] %v2479_v48   ;;  %v2752_v1 = vpop.f32.mrb[28].mxu1 }
 0x3a1   : > { %v3188_v57 = vpop.eup %3187  ;;  %v1860_v58 = vmul.f32 %v3186_v53, %v4165_v33  ;;  %3205 = vrcp.f32 %v1769_v49  ;;  %v2371_v36 = vmul.f32 -1.442695, %v4228_v61  ;;  %v2800_v5 = vpop.f32.mrb[28].mxu0 }
 0x3a2   : > { %v3190_v62 = vpop.eup %3189  ;;  %2534 = vst [vmem:[%s4059_s11 + $0x20] sm:$0xff] %v2474_v55   ;;  %v1858_v0 = vmul.f32 %v3188_v57, %v4167_v40  ;;  %3207 = vrcp.f32 %v1767_v54  ;;  %v1430_v33 = vpop.f32.mrb[29].mxu1  ;;  %v4235_v12 = vadd.f32 %v2800_v5, %v2752_v1 }
 0x3a3   : > { %v3192_v2 = vpop.eup %3191  ;;  %v1892_v3 = vmul.f32 1.6778524, %v1860_v58  ;;  %v1861_v4 = vmul.f32 %v3190_v62, %v4170_v47  ;;  %3209 = vpow2.f32 %v2372_v50  ;;  %v1639_v43 = vpop.f32.mrb[29].mxu0 }
 0x3a4   : > { %v3194_v6 = vpop.eup %3193  ;;  %v1890_v7 = vmul.f32 1.6778524, %v1858_v0  ;;  %v1859_v8 = vmul.f32 %v3192_v2, %v4173_v51  ;;  %3211 = vpow2.f32 %v2370_v59  ;;  %v2753_v40 = vpop.f32.mrb[30].mxu1  ;;  %v4237_v46 = vadd.f32 %v1639_v43, %v1430_v33 }
 0x3a5   : > { %v3196_v13 = vpop.eup %3195  ;;  %v1893_v16 = vmul.f32 1.6778524, %v1861_v4  ;;  %v1772_v17 = vadd.f32 1.0, %v3194_v6  ;;  %3213 = vpow2.f32 %v2373_v60  ;;  %v2801_v47 = vpop.f32.mrb[30].mxu0  ;;  %v2376_v51 = vmul.f32 -1.442695, %v4235_v12 }
 0x3a6   : > { %v1433_v18 = vpop.f32.mrb[31].mxu1  ;;  %v3198_v20 = vpop.eup %3197  ;;  %v1891_v21 = vmul.f32 1.6778524, %v1859_v8  ;;  %v1770_v23 = vadd.f32 1.0, %v3196_v13  ;;  %3215 = vpow2.f32 %v2371_v36  ;;  %v2374_v14 = vmul.f32 -1.442695, %v4237_v46 }
 0x3a7   : > { %v1642_v24 = vpop.f32.mrb[31].mxu0  ;;  %v3200_v25 = vpop.eup %3199  ;;  %v2489_v26 = vpack.c.bf16 %v1893_v16, %v1892_v3  ;;  %3217 = vrcp.f32 %v1772_v17  ;;  %v1773_v9 = vadd.f32 1.0, %v3198_v20  ;;  %v4241_v32 = vadd.f32 %v2801_v47, %v2753_v40 }
 0x3a8   : > { %v2484_v28 = vpack.c.bf16 %v1891_v21, %v1890_v7  ;;  %3219 = vrcp.f32 %v1770_v23  ;;  %v1771_v29 = vadd.f32 1.0, %v3200_v25  ;;  %v4244_v37 = vadd.f32 %v1642_v24, %v1433_v18 }
 0x3a9   : > { %v3202_v34 = vpop.eup %3201  ;;  %2537 = vst [vmem:[%s4059_s11 + $0x38] sm:$0xff] %v2489_v26   ;;  %3221 = vrcp.f32 %v1773_v9  ;;  %v2377_v41 = vmul.f32 -1.442695, %v4241_v32 }
 0x3aa   : > { %v3204_v19 = vpop.eup %3203  ;;  %2536 = vst [vmem:[%s4059_s11 + $0x30] sm:$0xff] %v2484_v28   ;;  %v1864_v38 = vmul.f32 %v3202_v34, %v4181_v39  ;;  %3223 = vrcp.f32 %v1771_v29  ;;  %v2375_v22 = vmul.f32 -1.442695, %v4244_v37 }
 0x3ab   : > { %v3206_v42 = vpop.eup %3205  ;;  %v1862_v44 = vmul.f32 %v3204_v19, %v4183_v15  ;;  %3225 = vpow2.f32 %v2376_v51 }
 0x3ac   : > { %v3208_v45 = vpop.eup %3207  ;;  %v1865_v48 = vmul.f32 %v3206_v42, %v4189_v30  ;;  %3227 = vpow2.f32 %v2374_v14  ;;  %v1896_v55 = vmul.f32 1.6778524, %v1864_v38 }
 0x3ad   : > { %v3210_v49 = vpop.eup %3209  ;;  %v1863_v50 = vmul.f32 %v3208_v45, %v4191_v31  ;;  %3229 = vpow2.f32 %v2377_v41  ;;  %v1894_v57 = vmul.f32 1.6778524, %v1862_v44 }
 0x3ae   : > { %v3212_v53 = vpop.eup %3211  ;;  %v1897_v39 = vmul.f32 1.6778524, %v1865_v48  ;;  %v1776_v54 = vadd.f32 1.0, %v3210_v49  ;;  %3231 = vpow2.f32 %v2375_v22 }
 0x3af   : > { %v3214_v59 = vpop.eup %3213  ;;  %v1895_v15 = vmul.f32 1.6778524, %v1863_v50  ;;  %v1774_v58 = vadd.f32 1.0, %v3212_v53 }
 0x3b0   : > { %v3216_v60 = vpop.eup %3215  ;;  %v2499_v62 = vpack.c.bf16 %v1897_v39, %v1896_v55  ;;  %3233 = vrcp.f32 %v1776_v54  ;;  %v1777_v30 = vadd.f32 1.0, %v3214_v59 }
 0x3b1   : > { %v3218_v0 = vpop.eup %3217  ;;  %v2494_v1 = vpack.c.bf16 %v1895_v15, %v1894_v57  ;;  %3235 = vrcp.f32 %v1774_v58  ;;  %v1775_v31 = vadd.f32 1.0, %v3216_v60 }
 0x3b2   : > { %v3220_v2 = vpop.eup %3219  ;;  %2539 = vst [vmem:[%s4059_s11 + $0x48] sm:$0xff] %v2499_v62   ;;  %v1868_v3 = vmul.f32 %v3218_v0, %v4199_v56  ;;  %3237 = vrcp.f32 %v1777_v30 }
 0x3b3   : > { %v3222_v4 = vpop.eup %3221  ;;  %2538 = vst [vmem:[%s4059_s11 + $0x40] sm:$0xff] %v2494_v1   ;;  %v1866_v36 = vmul.f32 %v3220_v2, %v4201_v63  ;;  %3239 = vrcp.f32 %v1775_v31 }
 0x3b4   : > { %v3224_v5 = vpop.eup %3223  ;;  %v1869_v33 = vmul.f32 %v3222_v4, %v4206_v10  ;;  %v1900_v43 = vmul.f32 1.6778524, %v1868_v3 }
 0x3b5   : > { %v3226_v6 = vpop.eup %3225  ;;  %v1867_v7 = vmul.f32 %v3224_v5, %v4208_v11  ;;  %v1898_v56 = vmul.f32 1.6778524, %v1866_v36 }
 0x3b6   : > { %v3228_v8 = vpop.eup %3227  ;;  %v1901_v40 = vmul.f32 1.6778524, %v1869_v33  ;;  %v1780_v13 = vadd.f32 1.0, %v3226_v6 }
 0x3b7   : > { %v3230_v16 = vpop.eup %3229  ;;  %v1899_v17 = vmul.f32 1.6778524, %v1867_v7  ;;  %v1778_v47 = vadd.f32 1.0, %v3228_v8 }
 0x3b8   : > { %v3232_v18 = vpop.eup %3231  ;;  %v2509_v20 = vpack.c.bf16 %v1901_v40, %v1900_v43  ;;  %3241 = vrcp.f32 %v1780_v13  ;;  %v1781_v63 = vadd.f32 1.0, %v3230_v16 }
 0x3b9   : > { %v2504_v21 = vpack.c.bf16 %v1899_v17, %v1898_v56  ;;  %3243 = vrcp.f32 %v1778_v47  ;;  %v1779_v10 = vadd.f32 1.0, %v3232_v18 }
 0x3ba   : > { %v3234_v23 = vpop.eup %3233  ;;  %2541 = vst [vmem:[%s4059_s11 + $0x58] sm:$0xff] %v2509_v20   ;;  %3245 = vrcp.f32 %v1781_v63 }
 0x3bb   : > { %v3236_v11 = vpop.eup %3235  ;;  %2540 = vst [vmem:[%s4059_s11 + $0x50] sm:$0xff] %v2504_v21   ;;  %v1872_v51 = vmul.f32 %v3234_v23, %v4217_v27  ;;  %3247 = vrcp.f32 %v1779_v10 }
 0x3bc   : > { %v3238_v24 = vpop.eup %3237  ;;  %v1870_v25 = vmul.f32 %v3236_v11, %v4219_v35 }
 0x3bd   : > { %v3240_v26 = vpop.eup %3239  ;;  %v1873_v9 = vmul.f32 %v3238_v24, %v4221_v52  ;;  %v1904_v28 = vmul.f32 1.6778524, %v1872_v51 }
 0x3be   : > { %v1871_v14 = vmul.f32 %v3240_v26, %v4228_v61  ;;  %v1902_v34 = vmul.f32 1.6778524, %v1870_v25 }
 0x3bf   : > { %v1905_v29 = vmul.f32 1.6778524, %v1873_v9 }
 0x3c0   : > { %v1903_v19 = vmul.f32 1.6778524, %v1871_v14 }
 0x3c1   : > { %v2519_v38 = vpack.c.bf16 %v1905_v29, %v1904_v28 }
 0x3c2   : > { %v3242_v41 = vpop.eup %3241  ;;  %v2514_v42 = vpack.c.bf16 %v1903_v19, %v1902_v34 }
 0x3c3   : > { %v3244_v44 = vpop.eup %3243  ;;  %2543 = vst [vmem:[%s4059_s11 + $0x68] sm:$0xff] %v2519_v38   ;;  %v1876_v27 = vmul.f32 %v3242_v41, %v4235_v12 }
 0x3c4   : > { %v3246_v22 = vpop.eup %3245  ;;  %2542 = vst [vmem:[%s4059_s11 + $0x60] sm:$0xff] %v2514_v42   ;;  %v1874_v35 = vmul.f32 %v3244_v44, %v4237_v46 }
 0x3c5   : > { %v3248_v52 = vpop.eup %3247  ;;  %v1877_v61 = vmul.f32 %v3246_v22, %v4241_v32  ;;  %v1908_v48 = vmul.f32 1.6778524, %v1876_v27 }
 0x3c6   : > { %v1875_v45 = vmul.f32 %v3248_v52, %v4244_v37  ;;  %v1906_v50 = vmul.f32 1.6778524, %v1874_v35 }
 0x3c7   : > { %v1909_v49 = vmul.f32 1.6778524, %v1877_v61 }
 0x3c8   : > { %v1907_v53 = vmul.f32 1.6778524, %v1875_v45 }
 0x3c9   : > { %v2529_v55 = vpack.c.bf16 %v1909_v49, %v1908_v48 }
 0x3ca   : > { %v2524_v39 = vpack.c.bf16 %v1907_v53, %v1906_v50 }
 0x3cb   : > { %2545 = vst [vmem:[%s4059_s11 + $0x78] sm:$0xff] %v2529_v55  }
 0x3cc   : > { %2544 = vst [vmem:[%s4059_s11 + $0x70] sm:$0xff] %v2524_v39  }
 0x3cd PF: > { %s4465_s21 = sld [smem:[#allocation31_spill]]  ;;  %s4467_s9 = sld [smem:[#allocation38_spill]] }
 0x3ce   : > { %s4468_s15 = sld [smem:[#allocation45_spill]]  ;;  %s2084_s30 = sshll.u32 %s4059_s11, 4  ;;  %s4280_s30 = int_to_ptr.vmem [resolvable:$true] %s2084_s30 }
 0x3cf   : > { %s4284_s8 = scalar_lea.sflag [#allocation8], %s338_s18  ;;  %s3417_s5 = scalar_lea.vmem %s4280_s30, 2048 }
 0x3d0   : > { %p3418_p5 = scmp.ne.s32.totalorder %s4280_s30, %s3417_s5  ;;  %s3592_s14 = smov [#allocation15]  }
 0x3d1   : > { %s3421_s7 = sshll.u32 %s3592_s14, 4  ;;  %s3422_s7 = int_to_ptr.vmem [resolvable:$false] %s3421_s7 }
 0x3d2   : > { %s3423_s13 = scalar_lea.vmem %s3422_s7, 4096  ;;  %p3424_p10 = scmp.lt.s32.totalorder %s4280_s30, %s3422_s7 }
 0x3d3   : > { %s2450_s17 = sshll.u32 %s4465_s21, 11  ;;  %p4469_p7 = scmp.ne.s32.totalorder %s4467_s9, 0 }
 0x3d4   : > { %s4277_s23 = scalar_lea.hbm %s4468_s15, %s2450_s17  ;;  %p3425_p8 = scmp.lt.s32.totalorder %s3423_s13, %s3417_s5 }
 0x3d5   : > { %p3419_p12 = pnand %p3418_p5, %p4469_p7 }
 0x3d6   : > { %p3426_p13 = por %p3425_p8, %p3424_p10 }
 0x3d7   : > { %p3420_p3 = pneg %p3419_p12 }
 0x3d9   : > { %p3427_p0 = pnand %p3426_p13, %p3420_p3 }
 0x3db   : > { %3430 = shalt.err (!%p3427_p0)
}
 0x3dc   : > { %s3431_s18 = scalar_lea.hbm %s4277_s23, 2048  ;;  %s3435_s28 = scalar_lea.hbm %s4468_s15, 4096 }
 0x3dd   : > { %p3432_p4 = scmp.ne.s32.totalorder %s4277_s23, %s3431_s18  ;;  %p3436_p6 = scmp.lt.u32.totalorder %s4277_s23, %s4468_s15 }
 0x3de   : > { %p3437_p1 = scmp.lt.u32.totalorder %s3435_s28, %s3431_s18  ;;  %p3439_p5 = scmp.lt.u32.totalorder %s3431_s18, %s4277_s23 }
 0x3df   : > { %p3433_p9 = pnand %p3432_p4, %p4469_p7 }
 0x3e0   : > { %p3438_p11 = por %p3437_p1, %p3436_p6 }
 0x3e1   : > { %p3434_p2 = pneg %p3433_p9 }
 0x3e2   : > { %p3440_p12 = por %p3439_p5, %p3438_p11 }
 0x3e4   : > { %p3441_p3 = pnand %p3440_p12, %p3434_p2 }
 0x3e6   : > { %3444 = shalt.err (!%p3441_p3)
}
 0x3e7   : > { %s3593_s29 = smov 64   ;;  %s3594_s6 = smov 4  }
 0x3e8   : > { %2868 = dma.vmem_to_hbm [thread:$0]  (%p4469_p7), %s4280_s30, 2048, %s4277_s23, %s4284_s8, %s3593_s29, %s3593_s29, %s3594_s6  }
 0x3e9 PF: > { %s4470_s21 = sld [smem:[#allocation26_spill]]  ;;  %s4471_s20 = sld [smem:[#allocation39_spill]] }
 0x3ea   : > { %p2900_p10 = scmp.ge.s32.totalorder %s3577_s27, 2 }
 0x3ef   : > { %s2099_s17 = sand.u32 1, %s4470_s21   ;;  %p4472_p8 = scmp.ne.s32.totalorder %s4471_s20, 0 }
 0x3f0   : > { %s2100_s12 = scalar_lea.sflag [#allocation8], %s2099_s17 }
 0x3f1   : > { %p2892_p13 = pnand %p2900_p10, %p4472_p8 }
 0x3f3   : > { %3520 = dma.done.wait (!%p2892_p13), %s2100_s12, 2048  }
 0x3f4   : > { %3522 = vsyncadd (!%p2892_p13), %s2100_s12, 4294965248  ;;  %s35_s27 = sadd.s32 1, %s3577_s27   ;;  %s4474_s17 = sld [smem:[#allocation27_spill]] }
 0x3f5   : > { %p4313_p0 = scmp.ge.s32.totalorder %s35_s27, 6   ;;  %s4475_s18 = sld [smem:[#allocation28_spill]] }
 0x3f6   : > { %s4476_s19 = sld [smem:[#allocation40_spill]]  ;;  %s4477_s20 = sld [smem:[#allocation29_spill]] }
 0x3f7   : > { %s4478_s23 = sld [smem:[#allocation32_spill]]  ;;  %s4479_s25 = sld [smem:[#allocation35_spill]] }
 0x3f8   : > { %s4480_s9 = sld [smem:[#allocation37_spill]]  ;;  %s4481_s0 = smov %s3529_s1 }
 0x3f9   : > { %s4482_s1 = smov %s3533_s16  ;;  %s4483_s16 = smov %s3929_s24 }
 0x3fa   : > { %s4484_s21 = smov %s3557_s22  ;;  %s4485_s22 = smov %s3916_s3 }
 0x3fb   : > { %s4486_s24 = smov %s3573_s26  ;;  %34 = sbr.rel (!%p4313_p0) target bundleno = 36 (0x24), region = 129 }
 0x3fe   : > { %s4487_s26 = smov %s4480_s9 }
 0x402   :  { %2105 = vsyncpa [#allocation7], 1 }
 0x403   :  { %2107 = vsyncpa [#allocation7 + $0x1], 1 }
 0x404   :  { %2108 = vsyncpa [#allocation10], 1 }
 0x405   :  { %2110 = vsyncpa [#allocation10 + $0x1], 1 }
 0x406   :  { %2111 = vsyncpa [#allocation13], 1 }
 0x407   :  { %2112 = vsyncpa [#allocation8], 1 }
 0x408   :  { %2114 = vsyncpa [#allocation8 + $0x1], 1 }

</bundles_post_ra>
